<compile_context>
chip_gen: v7x
topology: tpu7x:2x2x1
jax: 0.10.0
libtpu: 0.0.40
codegen_flags: <defaults>
</compile_context>

<pallas_src>
import functools
import math

import jax
import jax.numpy as jnp
from jax.experimental import pallas as pl
from jax.experimental.pallas import tpu as pltpu

D_MODEL = 32
# TODO(synk): the MultiHeadAttention class body is not provided in the reference;
# implemented as standard scaled-dot-product MHA with Q/K/V/O linear layers
# (each [D, D] with bias) and N_HEADS heads, eval mode (no dropout).
N_HEADS = 4
FF_HIDDEN = 2048
LN_EPS = 1e-5  # torch.nn.LayerNorm default


def _layernorm(x, gamma, beta):
    # x: [M, D]; gamma/beta: [1, D]; biased variance like torch.nn.LayerNorm
    mu = jnp.mean(x, axis=-1, keepdims=True)
    var = jnp.mean((x - mu) ** 2, axis=-1, keepdims=True)
    return (x - mu) * jax.lax.rsqrt(var + LN_EPS) * gamma + beta


def encoder_kernel(x_ref,
                   wq_ref, bq_ref, wk_ref, bk_ref, wv_ref, bv_ref, wo_ref, bo_ref,
                   ln1_g_ref, ln1_b_ref,
                   w1_ref, b1_ref, w2_ref, b2_ref,
                   ln2_g_ref, ln2_b_ref,
                   o_ref,
                   *, batch, seq_len):
    x = x_ref[...]                               # [M, D] f32, M = batch * seq_len
    M, D = x.shape
    L = seq_len
    hd = D // N_HEADS
    scale = 1.0 / math.sqrt(float(hd))

    xb = x.astype(jnp.bfloat16)                  # bf16 into the MXU, f32 accumulation
    q = jnp.dot(xb, wq_ref[...], preferred_element_type=jnp.float32) + bq_ref[...]
    k = jnp.dot(xb, wk_ref[...], preferred_element_type=jnp.float32) + bk_ref[...]
    v = jnp.dot(xb, wv_ref[...], preferred_element_type=jnp.float32) + bv_ref[...]

    # ---- attention: unrolled static slices per (batch, head); no reshape/transpose
    dn = (((1,), (1,)), ((), ()))                # contract last dims: q @ k^T
    ctx_rows = []
    for b in range(batch):
        r0 = b * L
        head_ctx = []
        for h in range(N_HEADS):
            c0 = h * hd
            qh = q[r0:r0 + L, c0:c0 + hd]        # [L, hd] static slices (cheap)
            kh = k[r0:r0 + L, c0:c0 + hd]
            vh = v[r0:r0 + L, c0:c0 + hd]
            s = jax.lax.dot_general(qh, kh, dn,
                                    preferred_element_type=jnp.float32) * scale
            s = s - jnp.max(s, axis=-1, keepdims=True)
            p = jnp.exp(s)
            p = p * pl.reciprocal(jnp.sum(p, axis=-1, keepdims=True), approx=True)
            head_ctx.append(jnp.dot(p, vh, preferred_element_type=jnp.float32))
        ctx_rows.append(jnp.concatenate(head_ctx, axis=1))      # [L, D]
    ctx = jnp.concatenate(ctx_rows, axis=0)                     # [M, D]

    attn = jnp.dot(ctx.astype(jnp.bfloat16), wo_ref[...],
                   preferred_element_type=jnp.float32) + bo_ref[...]

    # ---- residual + LayerNorm (f32 elementwise) --------------------------
    h1 = _layernorm(x + attn, ln1_g_ref[...], ln1_b_ref[...])

    # ---- feed-forward (bf16 weights, f32 accumulation) --------------------
    ff = jnp.dot(h1.astype(jnp.bfloat16), w1_ref[...],
                 preferred_element_type=jnp.float32) + b1_ref[...]
    ff = jnp.maximum(ff, 0.0)
    ff = jnp.dot(ff.astype(jnp.bfloat16), w2_ref[...],
                 preferred_element_type=jnp.float32) + b2_ref[...]

    # ---- residual + LayerNorm ---------------------------------------------
    out = _layernorm(ff + h1, ln2_g_ref[...], ln2_b_ref[...])
    o_ref[...] = out.astype(o_ref.dtype)


def make_params(key, d_model=D_MODEL, ff_hidden=FF_HIDDEN):
    ks = jax.random.split(key, 8)
    s = 0.02
    f32 = jnp.float32
    bf16 = jnp.bfloat16   # matmul weights stored bf16: halves dominant HBM traffic
    return dict(
        wq=(s * jax.random.normal(ks[0], (d_model, d_model), f32)).astype(bf16),
        bq=jnp.zeros((1, d_model), f32),
        wk=(s * jax.random.normal(ks[1], (d_model, d_model), f32)).astype(bf16),
        bk=jnp.zeros((1, d_model), f32),
        wv=(s * jax.random.normal(ks[2], (d_model, d_model), f32)).astype(bf16),
        bv=jnp.zeros((1, d_model), f32),
        wo=(s * jax.random.normal(ks[3], (d_model, d_model), f32)).astype(bf16),
        bo=jnp.zeros((1, d_model), f32),
        ln1_g=jnp.ones((1, d_model), f32),
        ln1_b=jnp.zeros((1, d_model), f32),
        w1=(s * jax.random.normal(ks[4], (d_model, ff_hidden), f32)).astype(bf16),
        b1=0.01 * jax.random.normal(ks[5], (1, ff_hidden), f32),
        w2=(s * jax.random.normal(ks[6], (ff_hidden, d_model), f32)).astype(bf16),
        b2=0.01 * jax.random.normal(ks[7], (1, d_model), f32),
        ln2_g=jnp.ones((1, d_model), f32),
        ln2_b=jnp.zeros((1, d_model), f32),
    )


_PARAM_ORDER = ("wq", "bq", "wk", "bk", "wv", "bv", "wo", "bo",
                "ln1_g", "ln1_b", "w1", "b1", "w2", "b2", "ln2_g", "ln2_b")


@jax.jit
def encoder_forward(x, params):
    B, L, D = x.shape
    M = B * L
    x2 = x.reshape(M, D)                         # free wrapper-side layout plumbing
    param_list = [params[n] for n in _PARAM_ORDER]

    def full_spec(p):
        nd = p.ndim
        return pl.BlockSpec(p.shape, lambda i, _nd=nd: (0,) * _nd)

    in_specs = [pl.BlockSpec((M, D), lambda i: (0, 0))]
    in_specs += [full_spec(p) for p in param_list]
    out_spec = pl.BlockSpec((M, D), lambda i: (0, 0))

    # Advisory cost estimate for XLA's scheduler around the custom call.
    flops = (2 * M * (4 * D * D + 2 * D * FF_HIDDEN)
             + 4 * B * N_HEADS * L * L * (D // N_HEADS))
    transcendentals = B * N_HEADS * L * L + 4 * M
    bytes_accessed = (x2.size * x2.dtype.itemsize + M * D * 4
                      + sum(int(p.size) * p.dtype.itemsize for p in param_list))

    out2 = pl.pallas_call(
        functools.partial(encoder_kernel, batch=B, seq_len=L),
        out_shape=jax.ShapeDtypeStruct((M, D), x.dtype),
        grid=(1,),                               # single VMEM-resident step
        in_specs=in_specs,
        out_specs=out_spec,
        compiler_params=pltpu.CompilerParams(
            dimension_semantics=("arbitrary",)),
        cost_estimate=pl.CostEstimate(flops=int(flops),
                                      transcendentals=int(transcendentals),
                                      bytes_accessed=int(bytes_accessed)),
    )(x2, *param_list)
    return out2.reshape(B, L, D)


def encoder_reference(x, params):
    """Pure-JAX reference mirroring the kernel math (bf16 weights, f32 accumulation)."""
    f32, bf16 = jnp.float32, jnp.bfloat16

    def ln(v, g, b):
        mu = jnp.mean(v, axis=-1, keepdims=True)
        var = jnp.mean((v - mu) ** 2, axis=-1, keepdims=True)
        return (v - mu) * jax.lax.rsqrt(var + LN_EPS) * g + b

    def mm(a, w):
        return jnp.dot(a.astype(bf16), w, preferred_element_type=f32)

    B, L, D = x.shape
    hd = D // N_HEADS
    q = mm(x, params["wq"]) + params["bq"]
    k = mm(x, params["wk"]) + params["bk"]
    v = mm(x, params["wv"]) + params["bv"]
    qh = q.reshape(B, L, N_HEADS, hd).transpose(0, 2, 1, 3)
    kh = k.reshape(B, L, N_HEADS, hd).transpose(0, 2, 1, 3)
    vh = v.reshape(B, L, N_HEADS, hd).transpose(0, 2, 1, 3)
    sc = jnp.einsum("bhqd,bhkd->bhqk", qh, kh) / jnp.sqrt(float(hd))
    p = jax.nn.softmax(sc, axis=-1)
    ctx = jnp.einsum("bhqk,bhkd->bhqd", p, vh).transpose(0, 2, 1, 3).reshape(B, L, D)
    attn = mm(ctx, params["wo"]) + params["bo"]
    h = ln(x + attn, params["ln1_g"], params["ln1_b"])
    ff = jnp.maximum(mm(h, params["w1"]) + params["b1"], 0.0)
    ff = mm(ff, params["w2"]) + params["b2"]
    return ln(ff + h, params["ln2_g"], params["ln2_b"])


if __name__ == "__main__":
    key = jax.random.PRNGKey(0)
    k_x, k_p = jax.random.split(key)

    B, L, D = 2, 8, D_MODEL
    x = jax.random.normal(k_x, (B, L, D), jnp.float32)
    params = make_params(k_p)

    out = jax.block_until_ready(encoder_forward(x, params))
    ref = encoder_reference(x, params)

    assert out.shape == (B, L, D)
    # tolerance covers the approx EUP reciprocal in softmax + summation-order diffs
    assert jnp.allclose(out, ref, atol=5e-3, rtol=5e-3), "mismatch vs reference"

    print("KERNEL_OK")
</pallas_src>

<mosaic_0001>
module attributes {stable_mosaic.version = 11 : i64} {
  func.func @encoder_kernel(%arg0: i32, %arg1: memref<16x32xf32, #tpu.memory_space<vmem>>, %arg2: memref<32x32xbf16, #tpu.memory_space<vmem>>, %arg3: memref<1x32xf32, #tpu.memory_space<vmem>>, %arg4: memref<32x32xbf16, #tpu.memory_space<vmem>>, %arg5: memref<1x32xf32, #tpu.memory_space<vmem>>, %arg6: memref<32x32xbf16, #tpu.memory_space<vmem>>, %arg7: memref<1x32xf32, #tpu.memory_space<vmem>>, %arg8: memref<32x32xbf16, #tpu.memory_space<vmem>>, %arg9: memref<1x32xf32, #tpu.memory_space<vmem>>, %arg10: memref<1x32xf32, #tpu.memory_space<vmem>>, %arg11: memref<1x32xf32, #tpu.memory_space<vmem>>, %arg12: memref<32x2048xbf16, #tpu.memory_space<vmem>>, %arg13: memref<1x2048xf32, #tpu.memory_space<vmem>>, %arg14: memref<2048x32xbf16, #tpu.memory_space<vmem>>, %arg15: memref<1x32xf32, #tpu.memory_space<vmem>>, %arg16: memref<1x32xf32, #tpu.memory_space<vmem>>, %arg17: memref<1x32xf32, #tpu.memory_space<vmem>>, %arg18: memref<16x32xf32, #tpu.memory_space<vmem>>) attributes {dimension_semantics = [#tpu.dimension_semantics<arbitrary>], iteration_bounds = array<i64: 1>, scalar_prefetch = 0 : i64, scratch_operands = 0 : i64, tpu.core_type = #tpu.core_type<tc>, window_params = [{pipeline_mode = #tpu.pipeline_mode<synchronous>, transform_indices = @transform_0, window_bounds = array<i64: 16, 32>}, {pipeline_mode = #tpu.pipeline_mode<synchronous>, transform_indices = @transform_1, window_bounds = array<i64: 32, 32>}, {pipeline_mode = #tpu.pipeline_mode<synchronous>, transform_indices = @transform_2, window_bounds = array<i64: 1, 32>}, {pipeline_mode = #tpu.pipeline_mode<synchronous>, transform_indices = @transform_3, window_bounds = array<i64: 32, 32>}, {pipeline_mode = #tpu.pipeline_mode<synchronous>, transform_indices = @transform_4, window_bounds = array<i64: 1, 32>}, {pipeline_mode = #tpu.pipeline_mode<synchronous>, transform_indices = @transform_5, window_bounds = array<i64: 32, 32>}, {pipeline_mode = #tpu.pipeline_mode<synchronous>, transform_indices = @transform_6, window_bounds = array<i64: 1, 32>}, {pipeline_mode = #tpu.pipeline_mode<synchronous>, transform_indices = @transform_7, window_bounds = array<i64: 32, 32>}, {pipeline_mode = #tpu.pipeline_mode<synchronous>, transform_indices = @transform_8, window_bounds = array<i64: 1, 32>}, {pipeline_mode = #tpu.pipeline_mode<synchronous>, transform_indices = @transform_9, window_bounds = array<i64: 1, 32>}, {pipeline_mode = #tpu.pipeline_mode<synchronous>, transform_indices = @transform_10, window_bounds = array<i64: 1, 32>}, {pipeline_mode = #tpu.pipeline_mode<synchronous>, transform_indices = @transform_11, window_bounds = array<i64: 32, 2048>}, {pipeline_mode = #tpu.pipeline_mode<synchronous>, transform_indices = @transform_12, window_bounds = array<i64: 1, 2048>}, {pipeline_mode = #tpu.pipeline_mode<synchronous>, transform_indices = @transform_13, window_bounds = array<i64: 2048, 32>}, {pipeline_mode = #tpu.pipeline_mode<synchronous>, transform_indices = @transform_14, window_bounds = array<i64: 1, 32>}, {pipeline_mode = #tpu.pipeline_mode<synchronous>, transform_indices = @transform_15, window_bounds = array<i64: 1, 32>}, {pipeline_mode = #tpu.pipeline_mode<synchronous>, transform_indices = @transform_16, window_bounds = array<i64: 1, 32>}, {pipeline_mode = #tpu.pipeline_mode<synchronous>, transform_indices = @transform_17, window_bounds = array<i64: 16, 32>}]} {
    %c0 = arith.constant 0 : index
    %c0_0 = arith.constant 0 : index
    %0 = vector.load %arg1[%c0, %c0_0] : memref<16x32xf32, #tpu.memory_space<vmem>>, vector<16x32xf32>
    %1 = arith.truncf %0 : vector<16x32xf32> to vector<16x32xbf16>
    %c0_1 = arith.constant 0 : index
    %c0_2 = arith.constant 0 : index
    %2 = vector.load %arg2[%c0_1, %c0_2] : memref<32x32xbf16, #tpu.memory_space<vmem>>, vector<32x32xbf16>
    %cst = arith.constant dense<0.000000e+00> : vector<16x32xf32>
    %3 = tpu.matmul %1, %2, %cst {dimension_numbers = #tpu.dot_dimension_numbers<[1], [0], [0], [1], [0, 0, 1, 1], [], []>} : vector<16x32xbf16>, vector<32x32xbf16>, vector<16x32xf32> -> vector<16x32xf32>
    %c0_3 = arith.constant 0 : index
    %c0_4 = arith.constant 0 : index
    %4 = vector.load %arg3[%c0_3, %c0_4] : memref<1x32xf32, #tpu.memory_space<vmem>>, vector<1x32xf32>
    %5 = vector.broadcast %4 : vector<1x32xf32> to vector<16x32xf32>
    %6 = arith.addf %3, %5 : vector<16x32xf32>
    %c0_5 = arith.constant 0 : index
    %c0_6 = arith.constant 0 : index
    %7 = vector.load %arg4[%c0_5, %c0_6] : memref<32x32xbf16, #tpu.memory_space<vmem>>, vector<32x32xbf16>
    %cst_7 = arith.constant dense<0.000000e+00> : vector<16x32xf32>
    %8 = tpu.matmul %1, %7, %cst_7 {dimension_numbers = #tpu.dot_dimension_numbers<[1], [0], [0], [1], [0, 0, 1, 1], [], []>} : vector<16x32xbf16>, vector<32x32xbf16>, vector<16x32xf32> -> vector<16x32xf32>
    %c0_8 = arith.constant 0 : index
    %c0_9 = arith.constant 0 : index
    %9 = vector.load %arg5[%c0_8, %c0_9] : memref<1x32xf32, #tpu.memory_space<vmem>>, vector<1x32xf32>
    %10 = vector.broadcast %9 : vector<1x32xf32> to vector<16x32xf32>
    %11 = arith.addf %8, %10 : vector<16x32xf32>
    %c0_10 = arith.constant 0 : index
    %c0_11 = arith.constant 0 : index
    %12 = vector.load %arg6[%c0_10, %c0_11] : memref<32x32xbf16, #tpu.memory_space<vmem>>, vector<32x32xbf16>
    %cst_12 = arith.constant dense<0.000000e+00> : vector<16x32xf32>
    %13 = tpu.matmul %1, %12, %cst_12 {dimension_numbers = #tpu.dot_dimension_numbers<[1], [0], [0], [1], [0, 0, 1, 1], [], []>} : vector<16x32xbf16>, vector<32x32xbf16>, vector<16x32xf32> -> vector<16x32xf32>
    %c0_13 = arith.constant 0 : index
    %c0_14 = arith.constant 0 : index
    %14 = vector.load %arg7[%c0_13, %c0_14] : memref<1x32xf32, #tpu.memory_space<vmem>>, vector<1x32xf32>
    %15 = vector.broadcast %14 : vector<1x32xf32> to vector<16x32xf32>
    %16 = arith.addf %13, %15 : vector<16x32xf32>
    %17 = vector.extract_strided_slice %6 {offsets = [0, 0], sizes = [8, 8], strides = [1, 1]} : vector<16x32xf32> to vector<8x8xf32>
    %18 = vector.extract_strided_slice %11 {offsets = [0, 0], sizes = [8, 8], strides = [1, 1]} : vector<16x32xf32> to vector<8x8xf32>
    %19 = vector.extract_strided_slice %16 {offsets = [0, 0], sizes = [8, 8], strides = [1, 1]} : vector<16x32xf32> to vector<8x8xf32>
    %cst_15 = arith.constant dense<0.000000e+00> : vector<8x8xf32>
    %20 = tpu.matmul %17, %18, %cst_15 {dimension_numbers = #tpu.dot_dimension_numbers<[1], [1], [0], [0], [0, 0, 1, 0], [], []>} : vector<8x8xf32>, vector<8x8xf32>, vector<8x8xf32> -> vector<8x8xf32>
    %cst_16 = arith.constant 0.353553385 : f32
    %21 = vector.broadcast %cst_16 : f32 to vector<8x8xf32>
    %22 = arith.mulf %20, %21 : vector<8x8xf32>
    %cst_17 = arith.constant dense<0xFF800000> : vector<8xf32>
    %23 = vector.multi_reduction <maximumf>, %22, %cst_17 [1] : vector<8x8xf32> to vector<8xf32>
    %24 = vector.shape_cast %23 : vector<8xf32> to vector<8x1xf32>
    %25 = vector.broadcast %24 : vector<8x1xf32> to vector<8x8xf32>
    %26 = arith.subf %22, %25 : vector<8x8xf32>
    %27 = math.exp %26 : vector<8x8xf32>
    %cst_18 = arith.constant dense<0.000000e+00> : vector<8xf32>
    %28 = vector.multi_reduction <add>, %27, %cst_18 [1] : vector<8x8xf32> to vector<8xf32>
    %29 = vector.shape_cast %28 : vector<8xf32> to vector<8x1xf32>
    %30 = tpu.reciprocal %29 {approx = true} : vector<8x1xf32> -> vector<8x1xf32>
    %31 = vector.broadcast %30 : vector<8x1xf32> to vector<8x8xf32>
    %32 = arith.mulf %27, %31 : vector<8x8xf32>
    %cst_19 = arith.constant dense<0.000000e+00> : vector<8x8xf32>
    %33 = tpu.matmul %32, %19, %cst_19 {dimension_numbers = #tpu.dot_dimension_numbers<[1], [0], [0], [1], [0, 0, 1, 1], [], []>} : vector<8x8xf32>, vector<8x8xf32>, vector<8x8xf32> -> vector<8x8xf32>
    %34 = vector.extract_strided_slice %6 {offsets = [0, 8], sizes = [8, 8], strides = [1, 1]} : vector<16x32xf32> to vector<8x8xf32>
    %35 = vector.extract_strided_slice %11 {offsets = [0, 8], sizes = [8, 8], strides = [1, 1]} : vector<16x32xf32> to vector<8x8xf32>
    %36 = vector.extract_strided_slice %16 {offsets = [0, 8], sizes = [8, 8], strides = [1, 1]} : vector<16x32xf32> to vector<8x8xf32>
    %cst_20 = arith.constant dense<0.000000e+00> : vector<8x8xf32>
    %37 = tpu.matmul %34, %35, %cst_20 {dimension_numbers = #tpu.dot_dimension_numbers<[1], [1], [0], [0], [0, 0, 1, 0], [], []>} : vector<8x8xf32>, vector<8x8xf32>, vector<8x8xf32> -> vector<8x8xf32>
    %cst_21 = arith.constant 0.353553385 : f32
    %38 = vector.broadcast %cst_21 : f32 to vector<8x8xf32>
    %39 = arith.mulf %37, %38 : vector<8x8xf32>
    %cst_22 = arith.constant dense<0xFF800000> : vector<8xf32>
    %40 = vector.multi_reduction <maximumf>, %39, %cst_22 [1] : vector<8x8xf32> to vector<8xf32>
    %41 = vector.shape_cast %40 : vector<8xf32> to vector<8x1xf32>
    %42 = vector.broadcast %41 : vector<8x1xf32> to vector<8x8xf32>
    %43 = arith.subf %39, %42 : vector<8x8xf32>
    %44 = math.exp %43 : vector<8x8xf32>
    %cst_23 = arith.constant dense<0.000000e+00> : vector<8xf32>
    %45 = vector.multi_reduction <add>, %44, %cst_23 [1] : vector<8x8xf32> to vector<8xf32>
    %46 = vector.shape_cast %45 : vector<8xf32> to vector<8x1xf32>
    %47 = tpu.reciprocal %46 {approx = true} : vector<8x1xf32> -> vector<8x1xf32>
    %48 = vector.broadcast %47 : vector<8x1xf32> to vector<8x8xf32>
    %49 = arith.mulf %44, %48 : vector<8x8xf32>
    %cst_24 = arith.constant dense<0.000000e+00> : vector<8x8xf32>
    %50 = tpu.matmul %49, %36, %cst_24 {dimension_numbers = #tpu.dot_dimension_numbers<[1], [0], [0], [1], [0, 0, 1, 1], [], []>} : vector<8x8xf32>, vector<8x8xf32>, vector<8x8xf32> -> vector<8x8xf32>
    %51 = vector.extract_strided_slice %6 {offsets = [0, 16], sizes = [8, 8], strides = [1, 1]} : vector<16x32xf32> to vector<8x8xf32>
    %52 = vector.extract_strided_slice %11 {offsets = [0, 16], sizes = [8, 8], strides = [1, 1]} : vector<16x32xf32> to vector<8x8xf32>
    %53 = vector.extract_strided_slice %16 {offsets = [0, 16], sizes = [8, 8], strides = [1, 1]} : vector<16x32xf32> to vector<8x8xf32>
    %cst_25 = arith.constant dense<0.000000e+00> : vector<8x8xf32>
    %54 = tpu.matmul %51, %52, %cst_25 {dimension_numbers = #tpu.dot_dimension_numbers<[1], [1], [0], [0], [0, 0, 1, 0], [], []>} : vector<8x8xf32>, vector<8x8xf32>, vector<8x8xf32> -> vector<8x8xf32>
    %cst_26 = arith.constant 0.353553385 : f32
    %55 = vector.broadcast %cst_26 : f32 to vector<8x8xf32>
    %56 = arith.mulf %54, %55 : vector<8x8xf32>
    %cst_27 = arith.constant dense<0xFF800000> : vector<8xf32>
    %57 = vector.multi_reduction <maximumf>, %56, %cst_27 [1] : vector<8x8xf32> to vector<8xf32>
    %58 = vector.shape_cast %57 : vector<8xf32> to vector<8x1xf32>
    %59 = vector.broadcast %58 : vector<8x1xf32> to vector<8x8xf32>
    %60 = arith.subf %56, %59 : vector<8x8xf32>
    %61 = math.exp %60 : vector<8x8xf32>
    %cst_28 = arith.constant dense<0.000000e+00> : vector<8xf32>
    %62 = vector.multi_reduction <add>, %61, %cst_28 [1] : vector<8x8xf32> to vector<8xf32>
    %63 = vector.shape_cast %62 : vector<8xf32> to vector<8x1xf32>
    %64 = tpu.reciprocal %63 {approx = true} : vector<8x1xf32> -> vector<8x1xf32>
    %65 = vector.broadcast %64 : vector<8x1xf32> to vector<8x8xf32>
    %66 = arith.mulf %61, %65 : vector<8x8xf32>
    %cst_29 = arith.constant dense<0.000000e+00> : vector<8x8xf32>
    %67 = tpu.matmul %66, %53, %cst_29 {dimension_numbers = #tpu.dot_dimension_numbers<[1], [0], [0], [1], [0, 0, 1, 1], [], []>} : vector<8x8xf32>, vector<8x8xf32>, vector<8x8xf32> -> vector<8x8xf32>
    %68 = vector.extract_strided_slice %6 {offsets = [0, 24], sizes = [8, 8], strides = [1, 1]} : vector<16x32xf32> to vector<8x8xf32>
    %69 = vector.extract_strided_slice %11 {offsets = [0, 24], sizes = [8, 8], strides = [1, 1]} : vector<16x32xf32> to vector<8x8xf32>
    %70 = vector.extract_strided_slice %16 {offsets = [0, 24], sizes = [8, 8], strides = [1, 1]} : vector<16x32xf32> to vector<8x8xf32>
    %cst_30 = arith.constant dense<0.000000e+00> : vector<8x8xf32>
    %71 = tpu.matmul %68, %69, %cst_30 {dimension_numbers = #tpu.dot_dimension_numbers<[1], [1], [0], [0], [0, 0, 1, 0], [], []>} : vector<8x8xf32>, vector<8x8xf32>, vector<8x8xf32> -> vector<8x8xf32>
    %cst_31 = arith.constant 0.353553385 : f32
    %72 = vector.broadcast %cst_31 : f32 to vector<8x8xf32>
    %73 = arith.mulf %71, %72 : vector<8x8xf32>
    %cst_32 = arith.constant dense<0xFF800000> : vector<8xf32>
    %74 = vector.multi_reduction <maximumf>, %73, %cst_32 [1] : vector<8x8xf32> to vector<8xf32>
    %75 = vector.shape_cast %74 : vector<8xf32> to vector<8x1xf32>
    %76 = vector.broadcast %75 : vector<8x1xf32> to vector<8x8xf32>
    %77 = arith.subf %73, %76 : vector<8x8xf32>
    %78 = math.exp %77 : vector<8x8xf32>
    %cst_33 = arith.constant dense<0.000000e+00> : vector<8xf32>
    %79 = vector.multi_reduction <add>, %78, %cst_33 [1] : vector<8x8xf32> to vector<8xf32>
    %80 = vector.shape_cast %79 : vector<8xf32> to vector<8x1xf32>
    %81 = tpu.reciprocal %80 {approx = true} : vector<8x1xf32> -> vector<8x1xf32>
    %82 = vector.broadcast %81 : vector<8x1xf32> to vector<8x8xf32>
    %83 = arith.mulf %78, %82 : vector<8x8xf32>
    %cst_34 = arith.constant dense<0.000000e+00> : vector<8x8xf32>
    %84 = tpu.matmul %83, %70, %cst_34 {dimension_numbers = #tpu.dot_dimension_numbers<[1], [0], [0], [1], [0, 0, 1, 1], [], []>} : vector<8x8xf32>, vector<8x8xf32>, vector<8x8xf32> -> vector<8x8xf32>
    %85 = tpu.concatenate %33, %50, %67, %84 in 1 : vector<8x8xf32>, vector<8x8xf32>, vector<8x8xf32>, vector<8x8xf32> -> vector<8x32xf32>
    %86 = vector.extract_strided_slice %6 {offsets = [8, 0], sizes = [8, 8], strides = [1, 1]} : vector<16x32xf32> to vector<8x8xf32>
    %87 = vector.extract_strided_slice %11 {offsets = [8, 0], sizes = [8, 8], strides = [1, 1]} : vector<16x32xf32> to vector<8x8xf32>
    %88 = vector.extract_strided_slice %16 {offsets = [8, 0], sizes = [8, 8], strides = [1, 1]} : vector<16x32xf32> to vector<8x8xf32>
    %cst_35 = arith.constant dense<0.000000e+00> : vector<8x8xf32>
    %89 = tpu.matmul %86, %87, %cst_35 {dimension_numbers = #tpu.dot_dimension_numbers<[1], [1], [0], [0], [0, 0, 1, 0], [], []>} : vector<8x8xf32>, vector<8x8xf32>, vector<8x8xf32> -> vector<8x8xf32>
    %cst_36 = arith.constant 0.353553385 : f32
    %90 = vector.broadcast %cst_36 : f32 to vector<8x8xf32>
    %91 = arith.mulf %89, %90 : vector<8x8xf32>
    %cst_37 = arith.constant dense<0xFF800000> : vector<8xf32>
    %92 = vector.multi_reduction <maximumf>, %91, %cst_37 [1] : vector<8x8xf32> to vector<8xf32>
    %93 = vector.shape_cast %92 : vector<8xf32> to vector<8x1xf32>
    %94 = vector.broadcast %93 : vector<8x1xf32> to vector<8x8xf32>
    %95 = arith.subf %91, %94 : vector<8x8xf32>
    %96 = math.exp %95 : vector<8x8xf32>
    %cst_38 = arith.constant dense<0.000000e+00> : vector<8xf32>
    %97 = vector.multi_reduction <add>, %96, %cst_38 [1] : vector<8x8xf32> to vector<8xf32>
    %98 = vector.shape_cast %97 : vector<8xf32> to vector<8x1xf32>
    %99 = tpu.reciprocal %98 {approx = true} : vector<8x1xf32> -> vector<8x1xf32>
    %100 = vector.broadcast %99 : vector<8x1xf32> to vector<8x8xf32>
    %101 = arith.mulf %96, %100 : vector<8x8xf32>
    %cst_39 = arith.constant dense<0.000000e+00> : vector<8x8xf32>
    %102 = tpu.matmul %101, %88, %cst_39 {dimension_numbers = #tpu.dot_dimension_numbers<[1], [0], [0], [1], [0, 0, 1, 1], [], []>} : vector<8x8xf32>, vector<8x8xf32>, vector<8x8xf32> -> vector<8x8xf32>
    %103 = vector.extract_strided_slice %6 {offsets = [8, 8], sizes = [8, 8], strides = [1, 1]} : vector<16x32xf32> to vector<8x8xf32>
    %104 = vector.extract_strided_slice %11 {offsets = [8, 8], sizes = [8, 8], strides = [1, 1]} : vector<16x32xf32> to vector<8x8xf32>
    %105 = vector.extract_strided_slice %16 {offsets = [8, 8], sizes = [8, 8], strides = [1, 1]} : vector<16x32xf32> to vector<8x8xf32>
    %cst_40 = arith.constant dense<0.000000e+00> : vector<8x8xf32>
    %106 = tpu.matmul %103, %104, %cst_40 {dimension_numbers = #tpu.dot_dimension_numbers<[1], [1], [0], [0], [0, 0, 1, 0], [], []>} : vector<8x8xf32>, vector<8x8xf32>, vector<8x8xf32> -> vector<8x8xf32>
    %cst_41 = arith.constant 0.353553385 : f32
    %107 = vector.broadcast %cst_41 : f32 to vector<8x8xf32>
    %108 = arith.mulf %106, %107 : vector<8x8xf32>
    %cst_42 = arith.constant dense<0xFF800000> : vector<8xf32>
    %109 = vector.multi_reduction <maximumf>, %108, %cst_42 [1] : vector<8x8xf32> to vector<8xf32>
    %110 = vector.shape_cast %109 : vector<8xf32> to vector<8x1xf32>
    %111 = vector.broadcast %110 : vector<8x1xf32> to vector<8x8xf32>
    %112 = arith.subf %108, %111 : vector<8x8xf32>
    %113 = math.exp %112 : vector<8x8xf32>
    %cst_43 = arith.constant dense<0.000000e+00> : vector<8xf32>
    %114 = vector.multi_reduction <add>, %113, %cst_43 [1] : vector<8x8xf32> to vector<8xf32>
    %115 = vector.shape_cast %114 : vector<8xf32> to vector<8x1xf32>
    %116 = tpu.reciprocal %115 {approx = true} : vector<8x1xf32> -> vector<8x1xf32>
    %117 = vector.broadcast %116 : vector<8x1xf32> to vector<8x8xf32>
    %118 = arith.mulf %113, %117 : vector<8x8xf32>
    %cst_44 = arith.constant dense<0.000000e+00> : vector<8x8xf32>
    %119 = tpu.matmul %118, %105, %cst_44 {dimension_numbers = #tpu.dot_dimension_numbers<[1], [0], [0], [1], [0, 0, 1, 1], [], []>} : vector<8x8xf32>, vector<8x8xf32>, vector<8x8xf32> -> vector<8x8xf32>
    %120 = vector.extract_strided_slice %6 {offsets = [8, 16], sizes = [8, 8], strides = [1, 1]} : vector<16x32xf32> to vector<8x8xf32>
    %121 = vector.extract_strided_slice %11 {offsets = [8, 16], sizes = [8, 8], strides = [1, 1]} : vector<16x32xf32> to vector<8x8xf32>
    %122 = vector.extract_strided_slice %16 {offsets = [8, 16], sizes = [8, 8], strides = [1, 1]} : vector<16x32xf32> to vector<8x8xf32>
    %cst_45 = arith.constant dense<0.000000e+00> : vector<8x8xf32>
    %123 = tpu.matmul %120, %121, %cst_45 {dimension_numbers = #tpu.dot_dimension_numbers<[1], [1], [0], [0], [0, 0, 1, 0], [], []>} : vector<8x8xf32>, vector<8x8xf32>, vector<8x8xf32> -> vector<8x8xf32>
    %cst_46 = arith.constant 0.353553385 : f32
    %124 = vector.broadcast %cst_46 : f32 to vector<8x8xf32>
    %125 = arith.mulf %123, %124 : vector<8x8xf32>
    %cst_47 = arith.constant dense<0xFF800000> : vector<8xf32>
    %126 = vector.multi_reduction <maximumf>, %125, %cst_47 [1] : vector<8x8xf32> to vector<8xf32>
    %127 = vector.shape_cast %126 : vector<8xf32> to vector<8x1xf32>
    %128 = vector.broadcast %127 : vector<8x1xf32> to vector<8x8xf32>
    %129 = arith.subf %125, %128 : vector<8x8xf32>
    %130 = math.exp %129 : vector<8x8xf32>
    %cst_48 = arith.constant dense<0.000000e+00> : vector<8xf32>
    %131 = vector.multi_reduction <add>, %130, %cst_48 [1] : vector<8x8xf32> to vector<8xf32>
    %132 = vector.shape_cast %131 : vector<8xf32> to vector<8x1xf32>
    %133 = tpu.reciprocal %132 {approx = true} : vector<8x1xf32> -> vector<8x1xf32>
    %134 = vector.broadcast %133 : vector<8x1xf32> to vector<8x8xf32>
    %135 = arith.mulf %130, %134 : vector<8x8xf32>
    %cst_49 = arith.constant dense<0.000000e+00> : vector<8x8xf32>
    %136 = tpu.matmul %135, %122, %cst_49 {dimension_numbers = #tpu.dot_dimension_numbers<[1], [0], [0], [1], [0, 0, 1, 1], [], []>} : vector<8x8xf32>, vector<8x8xf32>, vector<8x8xf32> -> vector<8x8xf32>
    %137 = vector.extract_strided_slice %6 {offsets = [8, 24], sizes = [8, 8], strides = [1, 1]} : vector<16x32xf32> to vector<8x8xf32>
    %138 = vector.extract_strided_slice %11 {offsets = [8, 24], sizes = [8, 8], strides = [1, 1]} : vector<16x32xf32> to vector<8x8xf32>
    %139 = vector.extract_strided_slice %16 {offsets = [8, 24], sizes = [8, 8], strides = [1, 1]} : vector<16x32xf32> to vector<8x8xf32>
    %cst_50 = arith.constant dense<0.000000e+00> : vector<8x8xf32>
    %140 = tpu.matmul %137, %138, %cst_50 {dimension_numbers = #tpu.dot_dimension_numbers<[1], [1], [0], [0], [0, 0, 1, 0], [], []>} : vector<8x8xf32>, vector<8x8xf32>, vector<8x8xf32> -> vector<8x8xf32>
    %cst_51 = arith.constant 0.353553385 : f32
    %141 = vector.broadcast %cst_51 : f32 to vector<8x8xf32>
    %142 = arith.mulf %140, %141 : vector<8x8xf32>
    %cst_52 = arith.constant dense<0xFF800000> : vector<8xf32>
    %143 = vector.multi_reduction <maximumf>, %142, %cst_52 [1] : vector<8x8xf32> to vector<8xf32>
    %144 = vector.shape_cast %143 : vector<8xf32> to vector<8x1xf32>
    %145 = vector.broadcast %144 : vector<8x1xf32> to vector<8x8xf32>
    %146 = arith.subf %142, %145 : vector<8x8xf32>
    %147 = math.exp %146 : vector<8x8xf32>
    %cst_53 = arith.constant dense<0.000000e+00> : vector<8xf32>
    %148 = vector.multi_reduction <add>, %147, %cst_53 [1] : vector<8x8xf32> to vector<8xf32>
    %149 = vector.shape_cast %148 : vector<8xf32> to vector<8x1xf32>
    %150 = tpu.reciprocal %149 {approx = true} : vector<8x1xf32> -> vector<8x1xf32>
    %151 = vector.broadcast %150 : vector<8x1xf32> to vector<8x8xf32>
    %152 = arith.mulf %147, %151 : vector<8x8xf32>
    %cst_54 = arith.constant dense<0.000000e+00> : vector<8x8xf32>
    %153 = tpu.matmul %152, %139, %cst_54 {dimension_numbers = #tpu.dot_dimension_numbers<[1], [0], [0], [1], [0, 0, 1, 1], [], []>} : vector<8x8xf32>, vector<8x8xf32>, vector<8x8xf32> -> vector<8x8xf32>
    %154 = tpu.concatenate %102, %119, %136, %153 in 1 : vector<8x8xf32>, vector<8x8xf32>, vector<8x8xf32>, vector<8x8xf32> -> vector<8x32xf32>
    %155 = tpu.concatenate %85, %154 in 0 : vector<8x32xf32>, vector<8x32xf32> -> vector<16x32xf32>
    %156 = arith.truncf %155 : vector<16x32xf32> to vector<16x32xbf16>
    %c0_55 = arith.constant 0 : index
    %c0_56 = arith.constant 0 : index
    %157 = vector.load %arg8[%c0_55, %c0_56] : memref<32x32xbf16, #tpu.memory_space<vmem>>, vector<32x32xbf16>
    %cst_57 = arith.constant dense<0.000000e+00> : vector<16x32xf32>
    %158 = tpu.matmul %156, %157, %cst_57 {dimension_numbers = #tpu.dot_dimension_numbers<[1], [0], [0], [1], [0, 0, 1, 1], [], []>} : vector<16x32xbf16>, vector<32x32xbf16>, vector<16x32xf32> -> vector<16x32xf32>
    %c0_58 = arith.constant 0 : index
    %c0_59 = arith.constant 0 : index
    %159 = vector.load %arg9[%c0_58, %c0_59] : memref<1x32xf32, #tpu.memory_space<vmem>>, vector<1x32xf32>
    %160 = vector.broadcast %159 : vector<1x32xf32> to vector<16x32xf32>
    %161 = arith.addf %158, %160 : vector<16x32xf32>
    %162 = arith.addf %0, %161 : vector<16x32xf32>
    %c0_60 = arith.constant 0 : index
    %c0_61 = arith.constant 0 : index
    %163 = vector.load %arg10[%c0_60, %c0_61] : memref<1x32xf32, #tpu.memory_space<vmem>>, vector<1x32xf32>
    %c0_62 = arith.constant 0 : index
    %c0_63 = arith.constant 0 : index
    %164 = vector.load %arg11[%c0_62, %c0_63] : memref<1x32xf32, #tpu.memory_space<vmem>>, vector<1x32xf32>
    %cst_64 = arith.constant dense<0.000000e+00> : vector<16xf32>
    %165 = vector.multi_reduction <add>, %162, %cst_64 [1] : vector<16x32xf32> to vector<16xf32>
    %166 = vector.shape_cast %165 : vector<16xf32> to vector<16x1xf32>
    %cst_65 = arith.constant 3.200000e+01 : f32
    %167 = vector.broadcast %cst_65 : f32 to vector<16x1xf32>
    %168 = arith.divf %166, %167 : vector<16x1xf32>
    %169 = vector.broadcast %168 : vector<16x1xf32> to vector<16x32xf32>
    %170 = arith.subf %162, %169 : vector<16x32xf32>
    %171 = arith.mulf %170, %170 : vector<16x32xf32>
    %cst_66 = arith.constant dense<0.000000e+00> : vector<16xf32>
    %172 = vector.multi_reduction <add>, %171, %cst_66 [1] : vector<16x32xf32> to vector<16xf32>
    %173 = vector.shape_cast %172 : vector<16xf32> to vector<16x1xf32>
    %cst_67 = arith.constant 3.200000e+01 : f32
    %174 = vector.broadcast %cst_67 : f32 to vector<16x1xf32>
    %175 = arith.divf %173, %174 : vector<16x1xf32>
    %176 = vector.broadcast %168 : vector<16x1xf32> to vector<16x32xf32>
    %177 = arith.subf %162, %176 : vector<16x32xf32>
    %cst_68 = arith.constant 9.99999974E-6 : f32
    %178 = vector.broadcast %cst_68 : f32 to vector<16x1xf32>
    %179 = arith.addf %175, %178 : vector<16x1xf32>
    %180 = math.rsqrt %179 : vector<16x1xf32>
    %181 = vector.broadcast %180 : vector<16x1xf32> to vector<16x32xf32>
    %182 = arith.mulf %177, %181 : vector<16x32xf32>
    %183 = vector.broadcast %163 : vector<1x32xf32> to vector<16x32xf32>
    %184 = arith.mulf %182, %183 : vector<16x32xf32>
    %185 = vector.broadcast %164 : vector<1x32xf32> to vector<16x32xf32>
    %186 = arith.addf %184, %185 : vector<16x32xf32>
    %187 = arith.truncf %186 : vector<16x32xf32> to vector<16x32xbf16>
    %c0_69 = arith.constant 0 : index
    %c0_70 = arith.constant 0 : index
    %188 = vector.load %arg12[%c0_69, %c0_70] : memref<32x2048xbf16, #tpu.memory_space<vmem>>, vector<32x2048xbf16>
    %cst_71 = arith.constant dense<0.000000e+00> : vector<16x2048xf32>
    %189 = tpu.matmul %187, %188, %cst_71 {dimension_numbers = #tpu.dot_dimension_numbers<[1], [0], [0], [1], [0, 0, 1, 1], [], []>} : vector<16x32xbf16>, vector<32x2048xbf16>, vector<16x2048xf32> -> vector<16x2048xf32>
    %c0_72 = arith.constant 0 : index
    %c0_73 = arith.constant 0 : index
    %190 = vector.load %arg13[%c0_72, %c0_73] : memref<1x2048xf32, #tpu.memory_space<vmem>>, vector<1x2048xf32>
    %191 = vector.broadcast %190 : vector<1x2048xf32> to vector<16x2048xf32>
    %192 = arith.addf %189, %191 : vector<16x2048xf32>
    %cst_74 = arith.constant 0.000000e+00 : f32
    %193 = vector.broadcast %cst_74 : f32 to vector<16x2048xf32>
    %194 = arith.maximumf %192, %193 : vector<16x2048xf32>
    %195 = arith.truncf %194 : vector<16x2048xf32> to vector<16x2048xbf16>
    %c0_75 = arith.constant 0 : index
    %c0_76 = arith.constant 0 : index
    %196 = vector.load %arg14[%c0_75, %c0_76] : memref<2048x32xbf16, #tpu.memory_space<vmem>>, vector<2048x32xbf16>
    %cst_77 = arith.constant dense<0.000000e+00> : vector<16x32xf32>
    %197 = tpu.matmul %195, %196, %cst_77 {dimension_numbers = #tpu.dot_dimension_numbers<[1], [0], [0], [1], [0, 0, 1, 1], [], []>} : vector<16x2048xbf16>, vector<2048x32xbf16>, vector<16x32xf32> -> vector<16x32xf32>
    %c0_78 = arith.constant 0 : index
    %c0_79 = arith.constant 0 : index
    %198 = vector.load %arg15[%c0_78, %c0_79] : memref<1x32xf32, #tpu.memory_space<vmem>>, vector<1x32xf32>
    %199 = vector.broadcast %198 : vector<1x32xf32> to vector<16x32xf32>
    %200 = arith.addf %197, %199 : vector<16x32xf32>
    %201 = arith.addf %200, %186 : vector<16x32xf32>
    %c0_80 = arith.constant 0 : index
    %c0_81 = arith.constant 0 : index
    %202 = vector.load %arg16[%c0_80, %c0_81] : memref<1x32xf32, #tpu.memory_space<vmem>>, vector<1x32xf32>
    %c0_82 = arith.constant 0 : index
    %c0_83 = arith.constant 0 : index
    %203 = vector.load %arg17[%c0_82, %c0_83] : memref<1x32xf32, #tpu.memory_space<vmem>>, vector<1x32xf32>
    %cst_84 = arith.constant dense<0.000000e+00> : vector<16xf32>
    %204 = vector.multi_reduction <add>, %201, %cst_84 [1] : vector<16x32xf32> to vector<16xf32>
    %205 = vector.shape_cast %204 : vector<16xf32> to vector<16x1xf32>
    %cst_85 = arith.constant 3.200000e+01 : f32
    %206 = vector.broadcast %cst_85 : f32 to vector<16x1xf32>
    %207 = arith.divf %205, %206 : vector<16x1xf32>
    %208 = vector.broadcast %207 : vector<16x1xf32> to vector<16x32xf32>
    %209 = arith.subf %201, %208 : vector<16x32xf32>
    %210 = arith.mulf %209, %209 : vector<16x32xf32>
    %cst_86 = arith.constant dense<0.000000e+00> : vector<16xf32>
    %211 = vector.multi_reduction <add>, %210, %cst_86 [1] : vector<16x32xf32> to vector<16xf32>
    %212 = vector.shape_cast %211 : vector<16xf32> to vector<16x1xf32>
    %cst_87 = arith.constant 3.200000e+01 : f32
    %213 = vector.broadcast %cst_87 : f32 to vector<16x1xf32>
    %214 = arith.divf %212, %213 : vector<16x1xf32>
    %215 = vector.broadcast %207 : vector<16x1xf32> to vector<16x32xf32>
    %216 = arith.subf %201, %215 : vector<16x32xf32>
    %cst_88 = arith.constant 9.99999974E-6 : f32
    %217 = vector.broadcast %cst_88 : f32 to vector<16x1xf32>
    %218 = arith.addf %214, %217 : vector<16x1xf32>
    %219 = math.rsqrt %218 : vector<16x1xf32>
    %220 = vector.broadcast %219 : vector<16x1xf32> to vector<16x32xf32>
    %221 = arith.mulf %216, %220 : vector<16x32xf32>
    %222 = vector.broadcast %202 : vector<1x32xf32> to vector<16x32xf32>
    %223 = arith.mulf %221, %222 : vector<16x32xf32>
    %224 = vector.broadcast %203 : vector<1x32xf32> to vector<16x32xf32>
    %225 = arith.addf %223, %224 : vector<16x32xf32>
    %c0_89 = arith.constant 0 : index
    %c0_90 = arith.constant 0 : index
    %226 = vector.load %arg18[%c0_89, %c0_90] : memref<16x32xf32, #tpu.memory_space<vmem>>, vector<16x32xf32>
    tpu.vector_store %arg18[%c0_89, %c0_90], %225 {strides = array<i32>} : memref<16x32xf32, #tpu.memory_space<vmem>>, vector<16x32xf32>,
    return
  }
  func.func @transform_0(%arg0: i32) -> (i32, i32) {
    %c0_i32 = arith.constant 0 : i32
    %c0_i32_0 = arith.constant 0 : i32
    %c0_i32_1 = arith.constant 0 : i32
    return %c0_i32, %c0_i32_0 : i32, i32
  }
  func.func @transform_1(%arg0: i32) -> (i32, i32) {
    %c0_i32 = arith.constant 0 : i32
    %c0_i32_0 = arith.constant 0 : i32
    %c0_i32_1 = arith.constant 0 : i32
    return %c0_i32, %c0_i32_0 : i32, i32
  }
  func.func @transform_2(%arg0: i32) -> (i32, i32) {
    %c0_i32 = arith.constant 0 : i32
    %c0_i32_0 = arith.constant 0 : i32
    %c0_i32_1 = arith.constant 0 : i32
    return %c0_i32, %c0_i32_0 : i32, i32
  }
  func.func @transform_3(%arg0: i32) -> (i32, i32) {
    %c0_i32 = arith.constant 0 : i32
    %c0_i32_0 = arith.constant 0 : i32
    %c0_i32_1 = arith.constant 0 : i32
    return %c0_i32, %c0_i32_0 : i32, i32
  }
  func.func @transform_4(%arg0: i32) -> (i32, i32) {
    %c0_i32 = arith.constant 0 : i32
    %c0_i32_0 = arith.constant 0 : i32
    %c0_i32_1 = arith.constant 0 : i32
    return %c0_i32, %c0_i32_0 : i32, i32
  }
  func.func @transform_5(%arg0: i32) -> (i32, i32) {
    %c0_i32 = arith.constant 0 : i32
    %c0_i32_0 = arith.constant 0 : i32
    %c0_i32_1 = arith.constant 0 : i32
    return %c0_i32, %c0_i32_0 : i32, i32
  }
  func.func @transform_6(%arg0: i32) -> (i32, i32) {
    %c0_i32 = arith.constant 0 : i32
    %c0_i32_0 = arith.constant 0 : i32
    %c0_i32_1 = arith.constant 0 : i32
    return %c0_i32, %c0_i32_0 : i32, i32
  }
  func.func @transform_7(%arg0: i32) -> (i32, i32) {
    %c0_i32 = arith.constant 0 : i32
    %c0_i32_0 = arith.constant 0 : i32
    %c0_i32_1 = arith.constant 0 : i32
    return %c0_i32, %c0_i32_0 : i32, i32
  }
  func.func @transform_8(%arg0: i32) -> (i32, i32) {
    %c0_i32 = arith.constant 0 : i32
    %c0_i32_0 = arith.constant 0 : i32
    %c0_i32_1 = arith.constant 0 : i32
    return %c0_i32, %c0_i32_0 : i32, i32
  }
  func.func @transform_9(%arg0: i32) -> (i32, i32) {
    %c0_i32 = arith.constant 0 : i32
    %c0_i32_0 = arith.constant 0 : i32
    %c0_i32_1 = arith.constant 0 : i32
    return %c0_i32, %c0_i32_0 : i32, i32
  }
  func.func @transform_10(%arg0: i32) -> (i32, i32) {
    %c0_i32 = arith.constant 0 : i32
    %c0_i32_0 = arith.constant 0 : i32
    %c0_i32_1 = arith.constant 0 : i32
    return %c0_i32, %c0_i32_0 : i32, i32
  }
  func.func @transform_11(%arg0: i32) -> (i32, i32) {
    %c0_i32 = arith.constant 0 : i32
    %c0_i32_0 = arith.constant 0 : i32
    %c0_i32_1 = arith.constant 0 : i32
    return %c0_i32, %c0_i32_0 : i32, i32
  }
  func.func @transform_12(%arg0: i32) -> (i32, i32) {
    %c0_i32 = arith.constant 0 : i32
    %c0_i32_0 = arith.constant 0 : i32
    %c0_i32_1 = arith.constant 0 : i32
    return %c0_i32, %c0_i32_0 : i32, i32
  }
  func.func @transform_13(%arg0: i32) -> (i32, i32) {
    %c0_i32 = arith.constant 0 : i32
    %c0_i32_0 = arith.constant 0 : i32
    %c0_i32_1 = arith.constant 0 : i32
    return %c0_i32, %c0_i32_0 : i32, i32
  }
  func.func @transform_14(%arg0: i32) -> (i32, i32) {
    %c0_i32 = arith.constant 0 : i32
    %c0_i32_0 = arith.constant 0 : i32
    %c0_i32_1 = arith.constant 0 : i32
    return %c0_i32, %c0_i32_0 : i32, i32
  }
  func.func @transform_15(%arg0: i32) -> (i32, i32) {
    %c0_i32 = arith.constant 0 : i32
    %c0_i32_0 = arith.constant 0 : i32
    %c0_i32_1 = arith.constant 0 : i32
    return %c0_i32, %c0_i32_0 : i32, i32
  }
  func.func @transform_16(%arg0: i32) -> (i32, i32) {
    %c0_i32 = arith.constant 0 : i32
    %c0_i32_0 = arith.constant 0 : i32
    %c0_i32_1 = arith.constant 0 : i32
    return %c0_i32, %c0_i32_0 : i32, i32
  }
  func.func @transform_17(%arg0: i32) -> (i32, i32) {
    %c0_i32 = arith.constant 0 : i32
    %c0_i32_0 = arith.constant 0 : i32
    %c0_i32_1 = arith.constant 0 : i32
    return %c0_i32, %c0_i32_0 : i32, i32
  }
}

</mosaic_0001>

<bundles_post_ra>
// kernel: encoder_forward.1
= control target key start
LH: loop header
LB: loop body
LE: loop exit
PB: predicated region body
PF: predicated region fallthrough
CT: control target
= control target key end

     0   :  { %s5542_s0 = inlined_call_operand.vmem [shape: f32[16,32], index: 0, kind: input, shape index: {}]   ;;  %s5543_s1 = inlined_call_operand.vmem [shape: bf16[32,32], index: 1, kind: input, shape index: {}]   ;;  %s5544_s2 = inlined_call_operand.vmem [shape: f32[1,32], index: 2, kind: input, shape index: {}]   ;;  %s5545_s3 = inlined_call_operand.vmem [shape: bf16[32,32], index: 3, kind: input, shape index: {}]   ;;  %s5546_s4 = inlined_call_operand.vmem [shape: f32[1,32], index: 4, kind: input, shape index: {}]   ;;  %s5547_s5 = inlined_call_operand.vmem [shape: bf16[32,32], index: 5, kind: input, shape index: {}]   ;;  %s5548_s6 = inlined_call_operand.vmem [shape: f32[1,32], index: 6, kind: input, shape index: {}]   ;;  %s5549_s7 = inlined_call_operand.vmem [shape: bf16[32,32], index: 7, kind: input, shape index: {}]   ;;  %s5550_s8 = inlined_call_operand.vmem [shape: f32[1,32], index: 8, kind: input, shape index: {}]   ;;  %s5551_s9 = inlined_call_operand.vmem [shape: f32[1,32], index: 9, kind: input, shape index: {}]   ;;  %s5552_s10 = inlined_call_operand.vmem [shape: f32[1,32], index: 10, kind: input, shape index: {}]   ;;  %s5553_s11 = inlined_call_operand.vmem [shape: bf16[32,2048], index: 11, kind: input, shape index: {}]   ;;  %s5554_s12 = inlined_call_operand.vmem [shape: f32[1,2048], index: 12, kind: input, shape index: {}]   ;;  %s5555_s13 = inlined_call_operand.vmem [shape: bf16[2048,32], index: 13, kind: input, shape index: {}]   ;;  %s5556_s14 = inlined_call_operand.vmem [shape: f32[1,32], index: 14, kind: input, shape index: {}]   ;;  %s5557_s15 = inlined_call_operand.vmem [shape: f32[1,32], index: 15, kind: input, shape index: {}]   ;;  %s5558_s16 = inlined_call_operand.vmem [shape: f32[1,32], index: 16, kind: input, shape index: {}]   ;;  %s5559_s17 = inlined_call_operand.hbm [shape: f32[16,32], index: 17, kind: output, shape index: {}]  }
   0x1   :  { %5562 = sst [smem:[#allocation5_spill]] %s5542_s0 }
   0x2   :  { %5563 = sst [smem:[#allocation6_spill]] %s5543_s1 }
   0x3   :  { %s5564_s26 = sld [smem:[#allocation6_spill]]  ;;  %v4593_v1 = vmov 0.0   ;;  %v4392_v2 = vld [vmem:[%s5545_s3] sm:$0xff]   ;;  %vm4594_vm0 = vmmov 0   ;;  %v4394_v4 = vld [vmem:[%s5545_s3 + $0x8] sm:$0xff]   ;;  %s5565_s20 = sld [smem:[#allocation5_spill]] }
   0x4   :  { %4253 = vmatprep.subr.bf16.mxu0 %v4593_v1  ;;  %4261 = vmatprep.subr.bf16.mxu1 %v4593_v1  ;;  %vm84_vm1 = vcmask 261120  }
   0x5   :  { %4257 = vmatprep.mubr.msk.bf16.mxu0 %vm4594_vm0, %v4593_v1  ;;  %4262 = vmatpush3.bf16.msra.mxu1 %v4392_v2 }
   0x6   :  { %4263 = vmatprep.subr.bf16.mxu1 %v4593_v1  ;;  %4265 = vmatprep.mubr.msk.bf16.mxu1 %vm4594_vm0, %v4593_v1 }
   0x9   :  { %v4391_v0 = vld [vmem:[%s5564_s26] sm:$0xff]   ;;  %v4393_v3 = vld [vmem:[%s5564_s26 + $0x8] sm:$0xff]   ;;  %4264 = vmatpush3.bf16.msra.mxu1 %v4394_v4 }
   0xa   :  { %4254 = vmatpush3.bf16.msra.mxu0 %v4391_v0  ;;  %v58_v5 = vld [vmem:[%s5565_s20] sm:$0xff]  ;;  %v59_v6 = vld [vmem:[%s5565_s20 + $0x8] sm:$0xff]  ;;  %4277 = vmatprep.subr.mxu1 %v4593_v1 }
   0xb   :  { %4255 = vmatprep.subr.bf16.mxu0 %v4593_v1  ;;  %v60_v7 = vpack.c.bf16 %v59_v6, %v58_v5 }
   0xd   :  { %4266 = vmatmul.mubr.msk.bf16.vlgmr.msra.gmra.mrb[0].mxu1 %vm84_vm1, %v60_v7 }
   0xe   :  { %4256 = vmatpush3.bf16.msra.mxu0 %v4393_v3  ;;  %4279 = vmatprep.mubr.msk.f32.mxu1 %vm4594_vm0, %v4593_v1 }
   0xf   :  { %4269 = vmatprep.subr.bf16.mxu0 %v4593_v1 }
  0x11   :  { %4258 = vmatmul.mubr.msk.bf16.vlgmr.msra.gmra.mrb[0].mxu0 %vm84_vm1, %v60_v7 }
  0x12   :  { %4273 = vmatprep.mubr.msk.bf16.mxu0 %vm4594_vm0, %v4593_v1 }
  0x13   :  { %22 = vsyncpa [#allocation3], 0  ;;  %v3824_v8 = vld [vmem:[%s5546_s4] ss:$0 sm:$0xff]  ;;  %vm257_vm2 = vcmask 64512   ;;  %s4595_s26 = smov 120  }
  0x14   :  { %v3820_v9 = vld [vmem:[%s5544_s2] ss:$0 sm:$0xff]  ;;  %s4596_s2 = smov 112   ;;  %s4597_s4 = smov 104   ;;  %v4396_v23 = vld [vmem:[%s5547_s5 + $0x8] sm:$0xff]   ;;  %vm931_vm3 = vcmask 130048  }
  0x15   :  { %v4395_v22 = vld [vmem:[%s5547_s5] sm:$0xff]   ;;  %s4598_s21 = smov 8   ;;  %s4599_s22 = smov 16   ;;  %vm933_vm4 = vcmask 195584  }
  0x16   :  { %4270 = vmatpush3.bf16.msra.mxu0 %v4395_v22  ;;  %v3828_v33 = vld [vmem:[%s5548_s6] ss:$0 sm:$0xff]  ;;  %s4600_s3 = smov 24  }
  0x17   :  { %4271 = vmatprep.subr.bf16.mxu0 %v4593_v1 }
  0x1a   :  { %4272 = vmatpush3.bf16.msra.mxu0 %v4396_v23 }
  0x1b   :  { %4297 = vmatprep.subr.mxu0 %v4593_v1 }
  0x1d   :  { %4274 = vmatmul.mubr.msk.bf16.vlgmr.msra.gmra.mrb[4].mxu0 %vm84_vm1, %v60_v7 }
  0x1e   :  { %4299 = vmatprep.mubr.msk.f32.mxu0 %vm4594_vm0, %v4593_v1 }
  0xe0   :  { %v186_v11 = vpop.f32.mrb[0].mxu1 }
  0xe1   :  { %v187_v13 = vadd.f32 %v3824_v8, %v186_v11  ;;  %v4267_v14 = vpop.f32.mrb[1].mxu1 }
  0xe2   :  { %v189_v17 = vpop.f32.mrb[2].mxu1 }
  0xe3   :  { %421 = vrot.lane.b32.xlu1 %v187_v13, %s4595_s26  ;;  %v4268_v19 = vpop.f32.mrb[3].mxu1  ;;  %4278 = vmatpush3.xpose.msk.msra.mxu1 %vm257_vm2, %v187_v13  ;;  %v190_v20 = vadd.f32 %v3824_v8, %v189_v17 }
  0xe4   :  { %v122_v10 = vpop.f32.mrb[0].mxu0  ;;  %4282 = vmatprep.subr.mxu1 %v4593_v1 }
  0xe5   :  { %v4259_v12 = vpop.f32.mrb[1].mxu0  ;;  %v123_v16 = vadd.f32 %v3820_v9, %v122_v10 }
  0xe6   :  { %v125_v15 = vpop.f32.mrb[2].mxu0 }
  0xe7   :  { %v4260_v18 = vpop.f32.mrb[3].mxu0  ;;  %4280 = vmatmul.mubr.msk.f32.vlgmr.msra.gmra.mrb[4].mxu1 %vm257_vm2, %v123_v16  ;;  %419 = vrot.lane.b32.xlu1 %v123_v16, %s4595_s26  ;;  %v126_v21 = vadd.f32 %v3820_v9, %v125_v15 }
  0xe8   :  { %4284 = vmatprep.mubr.msk.f32.mxu1 %vm4594_vm0, %v4593_v1 }
  0xeb   :  { %586 = vrot.lane.b32.xlu1 %v123_v16, %s4596_s2 }
  0xef   :  { %754 = vrot.lane.b32.xlu1 %v187_v13, %s4597_s4 }
  0xf0   :  { %v250_v34 = vpop.f32.mrb[4].mxu0 }
  0xf1   :  { %v4764_v35 = vadd.f32 %v3828_v33, %v250_v34  ;;  %v4275_v36 = vpop.f32.mrb[5].mxu0 }
  0xf2   :  { %v253_v37 = vpop.f32.mrb[6].mxu0 }
  0xf3   :  { %752 = vrot.lane.b32.xlu1 %v123_v16, %s4597_s4  ;;  %4283 = vmatpush3.msra.mxu1 %v4764_v35  ;;  %v4771_v38 = vadd.f32 %v3828_v33, %v253_v37  ;;  %v4276_v39 = vpop.f32.mrb[7].mxu0 }
  0xf4   :  { %4287 = vmatprep.subr.mxu1 %v4593_v1 }
  0xf7   :  { %1098 = vrot.lane.b32.xlu1 %v190_v20, %s4595_s26 }
  0xfb   :  { %1096 = vrot.lane.b32.xlu1 %v126_v21, %s4595_s26 }
  0xff   :  { %1265 = vrot.lane.b32.xlu1 %v190_v20, %s4596_s2 }
 0x103   :  { %1431 = vrot.lane.b32.xlu1 %v190_v20, %s4597_s4 }
 0x155   :  { %v422_v40 = vpop.permute.xlu1 %421 }
 0x159   :  { %v420_v41 = vpop.permute.xlu1 %419 }
 0x15d   :  { %v587_v42 = vpop.permute.xlu1 %586 }
 0x161   :  { %v755_v43 = vpop.permute.xlu1 %754 }
 0x165   :  { %v753_v44 = vpop.permute.xlu1 %752 }
 0x169   :  { %v1099_v47 = vpop.permute.xlu1 %1098 }
 0x16d   :  { %v1097_v49 = vpop.permute.xlu1 %1096 }
 0x171   :  { %v1266_v51 = vpop.permute.xlu1 %1265 }
 0x175   :  { %v1432_v53 = vpop.permute.xlu1 %1431 }
 0x1ba   :  { %v330_v24 = vpop.f32.mrb[4].mxu1 }
 0x1bb   :  { %v334_v25 = vmul.f32 0.35355338, %v330_v24  ;;  %v4281_v26 = vpop.f32.mrb[5].mxu1 }
 0x1bd   :  { %v335_v27 = vsel %vm257_vm2, %v334_v25, -inf }
 0x1be   :  { %336 = vmax.xlane.f32.xlu0 %v335_v27 }
 0x24b   :  { %v337_v28 = vpop.xlane.xlu0 %336 }
 0x24c   :  { %v338_v29 = vsub.f32 %v334_v25, %v337_v28 }
 0x24e   :  { %v339_v30 = vmul.f32 1.442695, %v338_v29 }
 0x250   :  { %4527 = vpow2.f32 %v339_v30 }
 0x25a   :  { %v4528_v31 = vpop.eup %4527 }
 0x25b   :  { %v341_v32 = vsel %vm257_vm2, %v4528_v31, 0.0 }
 0x25c   :  { %342 = vadd.xlane.f32.xlu0 %v341_v32 }
 0x272   :  { %588 = vrot.lane.b32.xlu0 %v187_v13, %s4596_s2 }
 0x276   :  { %1263 = vrot.lane.b32.xlu0 %v126_v21, %s4596_s2 }
 0x27a   :  { %1429 = vrot.lane.b32.xlu0 %v126_v21, %s4597_s4 }
 0x2e9   :  { %v343_v45 = vpop.xlane.xlu0 %342 }
 0x2ea   :  { %4529 = vrcp.f32 %v343_v45 }
 0x2ed   :  { %v589_v46 = vpop.permute.xlu0 %588 }
 0x2ee   :  { %4298 = vmatpush3.xpose.msk.msra.mxu0 %vm257_vm2, %v589_v46 }
 0x2ef   :  { %4307 = vmatprep.subr.mxu0 %v4593_v1 }
 0x2f1   :  { %4300 = vmatmul.mubr.msk.f32.vlgmr.msra.gmra.mrb[8].mxu0 %vm257_vm2, %v587_v42  ;;  %v1264_v52 = vpop.permute.xlu0 %1263 }
 0x2f2   :  { %4308 = vmatpush3.xpose.msk.msra.mxu0 %vm257_vm2, %v755_v43  ;;  %4309 = vmatprep.mubr.msk.f32.mxu0 %vm4594_vm0, %v4593_v1 }
 0x2f3   :  { %4317 = vmatprep.subr.mxu0 %v4593_v1 }
 0x2f4   :  { %v4530_v48 = vpop.eup %4529 }
 0x2f5   :  { %v345_v50 = vmul.f32 %v4530_v48, %v4528_v31  ;;  %4310 = vmatmul.mubr.msk.f32.vlgmr.msra.gmra.mrb[10].mxu0 %vm257_vm2, %v753_v44  ;;  %v1430_v54 = vpop.permute.xlu0 %1429 }
 0x2f6   :  { %4318 = vmatpush3.xpose.msk.msra.mxu0 %vm257_vm2, %v190_v20  ;;  %4319 = vmatprep.mubr.msk.f32.mxu0 %vm4594_vm0, %v4593_v1 }
 0x2f7   :  { %4285 = vmatmul.mubr.msk.f32.vlgmr.msra.gmra.mrb[6].mxu1 %vm257_vm2, %v345_v50  ;;  %4327 = vmatprep.subr.mxu0 %v4593_v1 }
 0x2f8   :  { %4288 = vmatpush3.xpose.msk.msra.mxu1 %vm257_vm2, %v422_v40  ;;  %4289 = vmatprep.mubr.msk.f32.mxu1 %vm4594_vm0, %v4593_v1 }
 0x2f9   :  { %4320 = vmatmul.mubr.msk.f32.vlgmr.msra.gmra.mrb[12].mxu0 %vm257_vm2, %v126_v21  ;;  %4292 = vmatprep.subr.mxu1 %v4593_v1 }
 0x2fa   :  { %4328 = vmatpush3.xpose.msk.msra.mxu0 %vm257_vm2, %v1099_v47  ;;  %4329 = vmatprep.mubr.msk.f32.mxu0 %vm4594_vm0, %v4593_v1 }
 0x2fb   :  { %4290 = vmatmul.mubr.msk.f32.vlgmr.msra.gmra.mrb[8].mxu1 %vm257_vm2, %v420_v41  ;;  %4337 = vmatprep.subr.mxu0 %v4593_v1 }
 0x2fc   :  { %4294 = vmatprep.mubr.msk.f32.mxu1 %vm4594_vm0, %v4593_v1 }
 0x2fd   :  { %4330 = vmatmul.mubr.msk.f32.vlgmr.msra.gmra.mrb[14].mxu0 %vm257_vm2, %v1097_v49 }
 0x2fe   :  { %4338 = vmatpush3.xpose.msk.msra.mxu0 %vm257_vm2, %v1266_v51  ;;  %4339 = vmatprep.mubr.msk.f32.mxu0 %vm4594_vm0, %v4593_v1 }
 0x2ff   :  { %4347 = vmatprep.subr.mxu0 %v4593_v1 }
 0x301   :  { %4340 = vmatmul.mubr.msk.f32.vlgmr.msra.gmra.mrb[16].mxu0 %vm257_vm2, %v1264_v52 }
 0x302   :  { %4348 = vmatpush3.xpose.msk.msra.mxu0 %vm257_vm2, %v1432_v53  ;;  %4349 = vmatprep.mubr.msk.f32.mxu0 %vm4594_vm0, %v4593_v1 }
 0x303   :  { %4357 = vmatprep.subr.bf16.mxu0 %v4593_v1 }
 0x305   :  { %4350 = vmatmul.mubr.msk.f32.vlgmr.msra.gmra.mrb[18].mxu0 %vm257_vm2, %v1430_v54 }
 0x306   :  { %4361 = vmatprep.mubr.msk.bf16.mxu0 %vm4594_vm0, %v4593_v1 }
 0x3c4   :  { %v660_v55 = vpop.f32.mrb[8].mxu0 }
 0x3c5   :  { %v664_v56 = vmul.f32 0.35355338, %v660_v55  ;;  %v4301_v57 = vpop.f32.mrb[9].mxu0 }
 0x3c7   :  { %v665_v58 = vsel %vm257_vm2, %v664_v56, -inf }
 0x3c8   :  { %666 = vmax.xlane.f32.xlu0 %v665_v58  ;;  %v826_v59 = vpop.f32.mrb[10].mxu0 }
 0x3c9   :  { %v830_v60 = vmul.f32 0.35355338, %v826_v59  ;;  %v4311_v61 = vpop.f32.mrb[11].mxu0 }
 0x3ca   :  { %v4812_v62 = vpop.f32.mrb[6].mxu1 }
 0x3cb   :  { %v4286_v63 = vpop.f32.mrb[7].mxu1  ;;  %v831_v0 = vsel %vm257_vm2, %v830_v60, -inf }
 0x3cc   :  { %832 = vmax.xlane.f32.xlu0 %v831_v0  ;;  %v1007_v2 = vpop.f32.mrb[12].mxu0 }
 0x3cd   :  { %v4321_v3 = vpop.f32.mrb[13].mxu0  ;;  %v1011_v8 = vmul.f32 0.35355338, %v1007_v2 }
 0x3ce   :  { %v493_v4 = vpop.f32.mrb[8].mxu1 }
 0x3cf   :  { %v4815_v5 = vmul.f32 0.35355338, %v493_v4  ;;  %v4291_v6 = vpop.f32.mrb[9].mxu1  ;;  %v1012_v16 = vsel %vm257_vm2, %v1011_v8, -inf }
 0x3d0   :  { %v1170_v7 = vpop.f32.mrb[14].mxu0 }
 0x3d1   :  { %v1174_v9 = vmul.f32 0.35355338, %v1170_v7  ;;  %v4331_v10 = vpop.f32.mrb[15].mxu0  ;;  %v498_v11 = vsel %vm257_vm2, %v4815_v5, -inf }
 0x3d2   :  { %499 = vmax.xlane.f32.xlu1 %v498_v11 }
 0x3d3   :  { %v1175_v12 = vsel %vm257_vm2, %v1174_v9, -inf }
 0x3d4   :  { %1176 = vmax.xlane.f32.xlu0 %v1175_v12  ;;  %v1337_v13 = vpop.f32.mrb[16].mxu0 }
 0x3d5   :  { %v1341_v14 = vmul.f32 0.35355338, %v1337_v13  ;;  %v4341_v15 = vpop.f32.mrb[17].mxu0 }
 0x3d6   :  { %1013 = vmax.xlane.f32.xlu1 %v1012_v16 }
 0x3d7   :  { %v1342_v20 = vsel %vm257_vm2, %v1341_v14, -inf }
 0x3d8   :  { %v1503_v17 = vpop.f32.mrb[18].mxu0 }
 0x3d9   :  { %v1507_v18 = vmul.f32 0.35355338, %v1503_v17  ;;  %v4351_v19 = vpop.f32.mrb[19].mxu0 }
 0x3da   :  { %1343 = vmax.xlane.f32.xlu1 %v1342_v20 }
 0x3db   :  { %v1508_v21 = vsel %vm257_vm2, %v1507_v18, -inf }
 0x3dc   :  { %1509 = vmax.xlane.f32.xlu0 %v1508_v21 }
 0x455   :  { %v667_v22 = vpop.xlane.xlu0 %666 }
 0x456   :  { %v668_v23 = vsub.f32 %v664_v56, %v667_v22 }
 0x458   :  { %v669_v24 = vmul.f32 1.442695, %v668_v23 }
 0x459   :  { %v833_v25 = vpop.xlane.xlu0 %832 }
 0x45a   :  { %4531 = vpow2.f32 %v669_v24  ;;  %v834_v26 = vsub.f32 %v830_v60, %v833_v25 }
 0x45c   :  { %v835_v27 = vmul.f32 1.442695, %v834_v26 }
 0x45e   :  { %4533 = vpow2.f32 %v835_v27 }
 0x45f   :  { %v500_v28 = vpop.xlane.xlu1 %499 }
 0x460   :  { %v501_v55 = vsub.f32 %v4815_v5, %v500_v28  ;;  %v4397_v28 = vld [vmem:[%s5549_s7] sm:$0xff]  }
 0x461   :  { %v1177_v29 = vpop.xlane.xlu0 %1176  ;;  %4358 = vmatpush3.bf16.msra.mxu0 %v4397_v28  ;;  %v1751_v28 = vld [vmem:[%s5553_s11 + $0xc8] sm:$0xff] }
 0x462   :  { %v1178_v30 = vsub.f32 %v1174_v9, %v1177_v29  ;;  %v502_v56 = vmul.f32 1.442695, %v501_v55  ;;  %4359 = vmatprep.subr.bf16.mxu0 %v4593_v1 }
 0x463   :  { %v1014_v31 = vpop.xlane.xlu1 %1013 }
 0x464   :  { %v4823_v32 = vpop.eup %4531  ;;  %v1179_v33 = vmul.f32 1.442695, %v1178_v30  ;;  %v1015_v34 = vsub.f32 %v1011_v8, %v1014_v31  ;;  %v4398_v31 = vld [vmem:[%s5549_s7 + $0x8] sm:$0xff]  }
 0x465   :  { %v671_v36 = vsel %vm257_vm2, %v4823_v32, 0.0  ;;  %4360 = vmatpush3.bf16.msra.mxu0 %v4398_v31 }
 0x466   :  { %4535 = vpow2.f32 %v1179_v33  ;;  %v1016_v37 = vmul.f32 1.442695, %v1015_v34  ;;  %672 = vadd.xlane.f32.xlu0 %v671_v36 }
 0x467   :  { %v1344_v39 = vpop.xlane.xlu1 %1343 }
 0x468   :  { %v4827_v40 = vpop.eup %4533  ;;  %4537 = vpow2.f32 %v1016_v37  ;;  %v1345_v41 = vsub.f32 %v1341_v14, %v1344_v39 }
 0x469   :  { %v1510_v42 = vpop.xlane.xlu0 %1509  ;;  %v837_v43 = vsel %vm257_vm2, %v4827_v40, 0.0 }
 0x46a   :  { %v1346_v44 = vmul.f32 1.442695, %v1345_v41  ;;  %v1511_v45 = vsub.f32 %v1507_v18, %v1510_v42  ;;  %838 = vadd.xlane.f32.xlu1 %v837_v43 }
 0x46c   :  { %4539 = vpow2.f32 %v1346_v44  ;;  %v1512_v46 = vmul.f32 1.442695, %v1511_v45 }
 0x46e   :  { %4541 = vpow2.f32 %v1512_v46 }
 0x46f   :  { %4543 = vpow2.f32 %v502_v56 }
 0x470   :  { %v4831_v47 = vpop.eup %4535 }
 0x471   :  { %v1181_v48 = vsel %vm257_vm2, %v4831_v47, 0.0 }
 0x472   :  { %v4538_v49 = vpop.eup %4537  ;;  %1182 = vadd.xlane.f32.xlu1 %v1181_v48 }
 0x473   :  { %v1018_v50 = vsel %vm257_vm2, %v4538_v49, 0.0 }
 0x474   :  { %1019 = vadd.xlane.f32.xlu0 %v1018_v50 }
 0x476   :  { %v4836_v51 = vpop.eup %4539 }
 0x477   :  { %v1348_v52 = vsel %vm257_vm2, %v4836_v51, 0.0 }
 0x478   :  { %v4840_v53 = vpop.eup %4541  ;;  %1349 = vadd.xlane.f32.xlu0 %v1348_v52 }
 0x479   :  { %v1514_v54 = vsel %vm257_vm2, %v4840_v53, 0.0  ;;  %v4544_v57 = vpop.eup %4543 }
 0x47a   :  { %1515 = vadd.xlane.f32.xlu1 %v1514_v54  ;;  %v504_v58 = vsel %vm257_vm2, %v4544_v57, 0.0 }
 0x48b   :  { %676 = vrot.lane.b32.xlu1 %v4764_v35, %s4596_s2 }
 0x48e   :  { %510 = vrot.lane.b32.xlu0 %v4764_v35, %s4595_s26 }
 0x492   :  { %1187 = vrot.lane.b32.xlu0 %v4771_v38, %s4595_s26 }
 0x496   :  { %1519 = vrot.lane.b32.xlu0 %v4771_v38, %s4597_s4 }
 0x4af   :  { %505 = vadd.xlane.f32.xlu1 %v504_v58  ;;  %v3856_v58 = vld [vmem:[%s5550_s8] ss:$0 sm:$0xff] }
 0x4c0   :  { %842 = vrot.lane.b32.xlu1 %v4764_v35, %s4597_s4 }
 0x4c4   :  { %1353 = vrot.lane.b32.xlu1 %v4771_v38, %s4596_s2 }
 0x4f3   :  { %v673_v59 = vpop.xlane.xlu0 %672 }
 0x4f7   :  { %v839_v0 = vpop.xlane.xlu1 %838 }
 0x4ff   :  { %v1183_v2 = vpop.xlane.xlu1 %1182 }
 0x501   :  { %v1020_v60 = vpop.xlane.xlu0 %1019 }
 0x505   :  { %v1350_v61 = vpop.xlane.xlu0 %1349 }
 0x507   :  { %v1516_v3 = vpop.xlane.xlu1 %1515 }
 0x509   :  { %v511_v63 = vpop.permute.xlu0 %510 }
 0x50a   :  { %4293 = vmatpush3.msra.mxu1 %v511_v63 }
 0x50b   :  { %4302 = vmatprep.subr.mxu1 %v4593_v1  ;;  %v677_v4 = vpop.permute.xlu1 %676 }
 0x50d   :  { %v1188_v15 = vpop.permute.xlu0 %1187 }
 0x511   :  { %v1520_v20 = vpop.permute.xlu0 %1519 }
 0x53c   :  { %v506_v5 = vpop.xlane.xlu1 %505 }
 0x53d   :  { %4545 = vrcp.f32 %v506_v5  ;;  %v4568_v5 = vld [vmem:[%s5565_s20 + $0x8] sm:$0xff] }
 0x53e   :  { %4547 = vrcp.f32 %v673_v59 }
 0x53f   :  { %4549 = vrcp.f32 %v839_v0 }
 0x540   :  { %4551 = vrcp.f32 %v1020_v60  ;;  %v843_v10 = vpop.permute.xlu1 %842 }
 0x541   :  { %4553 = vrcp.f32 %v1183_v2 }
 0x542   :  { %4555 = vrcp.f32 %v1350_v61 }
 0x543   :  { %4557 = vrcp.f32 %v1516_v3 }
 0x547   :  { %v4546_v6 = vpop.eup %4545 }
 0x548   :  { %v508_v35 = vmul.f32 %v4546_v6, %v4544_v57  ;;  %v4548_v7 = vpop.eup %4547 }
 0x549   :  { %v675_v8 = vmul.f32 %v4548_v7, %v4823_v32  ;;  %v4550_v9 = vpop.eup %4549 }
 0x54a   :  { %4295 = vmatmul.mubr.msk.f32.vlgmr.msra.gmra.mrb[10].mxu1 %vm257_vm2, %v508_v35  ;;  %v841_v11 = vmul.f32 %v4550_v9, %v4827_v40  ;;  %v4552_v12 = vpop.eup %4551 }
 0x54b   :  { %4303 = vmatpush3.msra.mxu1 %v677_v4  ;;  %4304 = vmatprep.mubr.msk.f32.mxu1 %vm4594_vm0, %v4593_v1  ;;  %v1022_v13 = vmul.f32 %v4552_v12, %v4538_v49  ;;  %v4554_v14 = vpop.eup %4553 }
 0x54c   :  { %4312 = vmatprep.subr.mxu1 %v4593_v1  ;;  %v1185_v16 = vmul.f32 %v4554_v14, %v4831_v47  ;;  %v4556_v17 = vpop.eup %4555 }
 0x54d   :  { %v1352_v18 = vmul.f32 %v4556_v17, %v4836_v51  ;;  %v4558_v19 = vpop.eup %4557  ;;  %v1726_v17 = vld [vmem:[%s5553_s11] sm:$0xff] }
 0x54e   :  { %4305 = vmatmul.mubr.msk.f32.vlgmr.msra.gmra.mrb[12].mxu1 %vm257_vm2, %v675_v8  ;;  %v1518_v21 = vmul.f32 %v4558_v19, %v4840_v53 }
 0x54f   :  { %4313 = vmatpush3.msra.mxu1 %v843_v10  ;;  %4314 = vmatprep.mubr.msk.f32.mxu1 %vm4594_vm0, %v4593_v1 }
 0x550   :  { %4322 = vmatprep.subr.mxu1 %v4593_v1 }
 0x552   :  { %4315 = vmatmul.mubr.msk.f32.vlgmr.msra.gmra.mrb[14].mxu1 %vm257_vm2, %v841_v11 }
 0x553   :  { %4323 = vmatpush3.msra.mxu1 %v4771_v38  ;;  %4324 = vmatprep.mubr.msk.f32.mxu1 %vm4594_vm0, %v4593_v1  ;;  %v1354_v38 = vpop.permute.xlu1 %1353 }
 0x554   :  { %4332 = vmatprep.subr.mxu1 %v4593_v1 }
 0x556   :  { %4325 = vmatmul.mubr.msk.f32.vlgmr.msra.gmra.mrb[16].mxu1 %vm257_vm2, %v1022_v13 }
 0x557   :  { %4333 = vmatpush3.msra.mxu1 %v1188_v15  ;;  %4334 = vmatprep.mubr.msk.f32.mxu1 %vm4594_vm0, %v4593_v1 }
 0x558   :  { %4342 = vmatprep.subr.mxu1 %v4593_v1 }
 0x55a   :  { %4335 = vmatmul.mubr.msk.f32.vlgmr.msra.gmra.mrb[18].mxu1 %vm257_vm2, %v1185_v16 }
 0x55b   :  { %4343 = vmatpush3.msra.mxu1 %v1354_v38  ;;  %4344 = vmatprep.mubr.msk.f32.mxu1 %vm4594_vm0, %v4593_v1  ;;  %v1734_v38 = vld [vmem:[%s5553_s11 + $0x40] sm:$0xff] }
 0x55c   :  { %4352 = vmatprep.subr.mxu1 %v4593_v1  ;;  %v3863_v19 = vcombine.high %v1726_v17, %v1734_v38 }
 0x55e   :  { %4345 = vmatmul.mubr.msk.f32.vlgmr.msra.gmra.mrb[20].mxu1 %vm257_vm2, %v1352_v18  ;;  %v1727_v18 = vld [vmem:[%s5553_s11 + $0x8] sm:$0xff] }
 0x55f   :  { %4353 = vmatpush3.msra.mxu1 %v1520_v20  ;;  %4354 = vmatprep.mubr.msk.f32.mxu1 %vm4594_vm0, %v4593_v1  ;;  %v1735_v20 = vld [vmem:[%s5553_s11 + $0x48] sm:$0xff] }
 0x560   :  { %2005 = vmatprep.subr.bf16.mxu1 %v3863_v19  ;;  %v1741_v19 = vld [vmem:[%s5553_s11 + $0x78] sm:$0xff] }
 0x562   :  { %4355 = vmatmul.mubr.msk.f32.vlgmr.msra.gmra.mrb[22].mxu1 %vm257_vm2, %v1518_v21  ;;  %v3862_v21 = vcombine.low %v1726_v17, %v1734_v38  ;;  %v1732_v17 = vld [vmem:[%s5553_s11 + $0x30] sm:$0xff] }
 0x563   :  { %v1740_v38 = vld [vmem:[%s5553_s11 + $0x70] sm:$0xff] }
 0x564   :  { %2006 = vmatpush1.bf16.msra.mxu1 %v3862_v21 }
 0x61d   :  { %v582_v22 = vpop.f32.mrb[10].mxu1 }
 0x61e   :  { %v4296_v23 = vpop.f32.mrb[11].mxu1 }
 0x61f   :  { %v3865_v23 = vcombine.high %v1727_v18, %v1735_v20 }
 0x621   :  { %v748_v24 = vpop.f32.mrb[12].mxu1  ;;  %2048 = vmatprep.subr.bf16.mxu0 %v3865_v23 }
 0x622   :  { %v4306_v25 = vpop.f32.mrb[13].mxu1 }
 0x623   :  { %v1750_v25 = vld [vmem:[%s5553_s11 + $0xc0] sm:$0xff] }
 0x625   :  { %v914_v26 = vpop.f32.mrb[14].mxu1 }
 0x626   :  { %v4316_v27 = vpop.f32.mrb[15].mxu1 }
 0x629   :  { %v1092_v29 = vpop.f32.mrb[16].mxu1 }
 0x62a   :  { %v4326_v30 = vpop.f32.mrb[17].mxu1 }
 0x62d   :  { %v1259_v32 = vpop.f32.mrb[18].mxu1 }
 0x62e   :  { %v4376_v33 = vpack.i.bf16 %v1259_v32, %v582_v22  ;;  %v4336_v34 = vpop.f32.mrb[19].mxu1  ;;  %v3864_v22 = vcombine.low %v1727_v18, %v1735_v20  ;;  %v1728_v32 = vld [vmem:[%s5553_s11 + $0x10] sm:$0xff]  ;;  %v1733_v18 = vld [vmem:[%s5553_s11 + $0x38] sm:$0xff] }
 0x62f   :  { %v1729_v34 = vld [vmem:[%s5553_s11 + $0x18] sm:$0xff]  ;;  %v3877_v23 = vcombine.high %v1733_v18, %v1741_v19 }
 0x630   :  { %4377 = vrot.lane.b32.xlu1 %v4376_v33, %s4598_s21  ;;  %v1736_v33 = vld [vmem:[%s5553_s11 + $0x50] sm:$0xff] }
 0x631   :  { %v1425_v36 = vpop.f32.mrb[20].mxu1 }
 0x632   :  { %v4381_v37 = vpack.i.bf16 %v1425_v36, %v748_v24  ;;  %v4346_v39 = vpop.f32.mrb[21].mxu1  ;;  %v1742_v24 = vld [vmem:[%s5553_s11 + $0x80] sm:$0xff]  ;;  %v4601_v36 = vmov 0  }
 0x633   :  { %v3879_v27 = vcombine.high %v1742_v24, %v1750_v25  ;;  %2037 = vmatprep.mubr.bf16.mxu1 %v4601_v36  ;;  %v1737_v39 = vld [vmem:[%s5553_s11 + $0x58] sm:$0xff] }
 0x634   :  { %4382 = vrot.lane.b32.xlu0 %v4381_v37, %s4599_s22  ;;  %v3867_v37 = vcombine.high %v1728_v32, %v1736_v33 }
 0x635   :  { %v1591_v40 = vpop.f32.mrb[22].mxu1  ;;  %2007 = vmatprep.subr.bf16.mxu1 %v3879_v27  ;;  %v1757_v27 = vld [vmem:[%s5553_s11 + $0xf8] sm:$0xff] }
 0x636   :  { %v4386_v41 = vpack.i.bf16 %v1591_v40, %v914_v26  ;;  %v4356_v42 = vpop.f32.mrb[23].mxu1  ;;  %v1743_v26 = vld [vmem:[%s5553_s11 + $0x88] sm:$0xff]  ;;  %v3866_v40 = vcombine.low %v1728_v32, %v1736_v33 }
 0x637   :  { %v3880_v30 = vcombine.low %v1743_v26, %v1751_v28  ;;  %v3881_v31 = vcombine.high %v1743_v26, %v1751_v28  ;;  %v3869_v42 = vcombine.high %v1729_v34, %v1737_v39  ;;  %v1749_v26 = vld [vmem:[%s5553_s11 + $0xb8] sm:$0xff]  ;;  %v3874_v28 = vcombine.low %v1732_v17, %v1740_v38 }
 0x638   :  { %4387 = vrot.lane.b32.xlu1 %v4386_v41, %s4600_s3  ;;  %v3868_v41 = vcombine.low %v1729_v34, %v1737_v39  ;;  %v3892_v33 = vcombine.low %v1749_v26, %v1757_v27  ;;  %v4399_v34 = vld [vmem:[%s5555_s13 + $0x40] sm:$0xff]   ;;  %s4602_s3 = smov [#allocation2]  }
 0x639   :  { %v4401_v39 = vld [vmem:[%s5555_s13] sm:$0xff]   ;;  %s3809_s7 = sshll.u32 %s4602_s3, 4  ;;  %s3810_s7 = int_to_ptr.vmem [resolvable:$true] %s3809_s7 }
 0x63a   :  { %s4569_s23 = scalar_lea.vmem %s3810_s7, 256  ;;  %p4574_p1 = scmp.lt.s32.totalorder %s3810_s7, %s3810_s7 }
 0x63b   :  { %p4570_p0 = scmp.ne.s32.totalorder %s3810_s7, %s4569_s23  ;;  %p4575_p2 = scmp.lt.s32.totalorder %s4569_s23, %s4569_s23 }
 0x63d   :  { %p4576_p3 = por %p4575_p2, %p4574_p1 }
 0x63f   :  { %p4577_p4 = pnand %p4576_p3, %p4570_p0 }
 0x6a2   :  { %v4378_v1 = vpop.permute.xlu1 %4377 }
 0x6a3   :  { %v4380_v44 = vunpack.i.h.bf16 %v4378_v1  ;;  %v4379_v45 = vunpack.i.l.bf16 %v4378_v1 }
 0x6a5   :  { %v1607_v49 = vsel %vm257_vm2, %v1092_v29, %v4380_v44  ;;  %v930_v50 = vsel %vm257_vm2, %v4812_v62, %v4379_v45  ;;  %v4567_v62 = vld [vmem:[%s5565_s20] sm:$0xff]  ;;  %v3878_v29 = vcombine.low %v1742_v24, %v1750_v25  ;;  %v1748_v24 = vld [vmem:[%s5553_s11 + $0xb0] sm:$0xff] }
 0x6a6   :  { %v4383_v43 = vpop.permute.xlu0 %4382  ;;  %v1756_v25 = vld [vmem:[%s5553_s11 + $0xf0] sm:$0xff] }
 0x6a7   :  { %v4385_v46 = vunpack.i.h.bf16 %v4383_v43  ;;  %v4384_v47 = vunpack.i.l.bf16 %v4383_v43  ;;  %2008 = vmatpush1.bf16.msra.mxu1 %v3878_v29  ;;  %v3876_v29 = vcombine.low %v1733_v18, %v1741_v19  ;;  %v3890_v32 = vcombine.low %v1748_v24, %v1756_v25 }
 0x6a8   :  { %2091 = vmatprep.subr.bf16.mxu1 %v3867_v37  ;;  %v4400_v37 = vld [vmem:[%s5555_s13 + $0xc0] sm:$0xff]  }
 0x6a9   :  { %v1608_v53 = vsel %vm931_vm3, %v1607_v49, %v4385_v46  ;;  %v932_v54 = vsel %vm931_vm3, %v930_v50, %v4384_v47  ;;  %v3860_v50 = vld [vmem:[%s5551_s9] ss:$0 sm:$0xff] }
 0x6aa   :  { %v4388_v48 = vpop.permute.xlu1 %4387 }
 0x6ab   :  { %v4390_v51 = vunpack.i.h.bf16 %v4388_v48  ;;  %v4389_v52 = vunpack.i.l.bf16 %v4388_v48 }
 0x6ad   :  { %v934_v55 = vsel %vm933_vm4, %v932_v54, %v4389_v52  ;;  %v1609_v56 = vsel %vm933_vm4, %v1608_v53, %v4390_v51  ;;  %v3861_v54 = vld [vmem:[%s5552_s10] ss:$0 sm:$0xff] }
 0x6ae   :  { %v1610_v57 = vpack.c.bf16 %v1609_v56, %v934_v55  ;;  %v1744_v56 = vld [vmem:[%s5553_s11 + $0x90] sm:$0xff] }
 0x6b0   :  { %4362 = vmatmul.mubr.msk.bf16.vlgmr.msra.gmra.mrb[20].mxu0 %vm84_vm1, %v1610_v57  ;;  %v1752_v57 = vld [vmem:[%s5553_s11 + $0xd0] sm:$0xff] }
 0x6b1   :  { %2049 = vmatpush1.bf16.msra.mxu0 %v3864_v22  ;;  %2080 = vmatprep.mubr.bf16.mxu0 %v4601_v36  ;;  %v3875_v22 = vcombine.high %v1732_v17, %v1740_v38 }
 0x6b2   :  { %2050 = vmatprep.subr.bf16.mxu0 %v3881_v31  ;;  %v3893_v31 = vcombine.high %v1749_v26, %v1757_v27 }
 0x6b5   :  { %2051 = vmatpush1.bf16.msra.mxu0 %v3880_v30  ;;  %v3891_v30 = vcombine.high %v1748_v24, %v1756_v25 }
 0x6b6   :  { %2134 = vmatprep.subr.bf16.mxu0 %v3869_v42  ;;  %v4405_v42 = vld [vmem:[%s5555_s13 + $0x8] sm:$0xff]  }
 0x783   :  { %v1671_v59 = vpop.f32.mrb[20].mxu0 }
 0x784   :  { %v1672_v60 = vadd.f32 %v3856_v58, %v1671_v59  ;;  %v4363_v61 = vpop.f32.mrb[21].mxu0  ;;  %v1753_v59 = vld [vmem:[%s5553_s11 + $0xd8] sm:$0xff] }
 0x785   :  { %v1674_v63 = vpop.f32.mrb[22].mxu0 }
 0x786   :  { %v1675_v0 = vadd.f32 %v3856_v58, %v1674_v63  ;;  %v4364_v2 = vpop.f32.mrb[23].mxu0  ;;  %v1678_v3 = vadd.f32 %v4567_v62, %v1672_v60  ;;  %v1745_v58 = vld [vmem:[%s5553_s11 + $0x98] sm:$0xff]  ;;  %v1730_v62 = vld [vmem:[%s5553_s11 + $0x20] sm:$0xff] }
 0x787   :  { %v3885_v2 = vcombine.high %v1745_v58, %v1753_v59 }
 0x788   :  { %v1682_v4 = vsel %vm84_vm1, %v1678_v3, 0.0  ;;  %v1679_v6 = vadd.f32 %v4568_v5, %v1675_v0  ;;  %v3883_v0 = vcombine.high %v1744_v56, %v1752_v57  ;;  %v1739_v5 = vld [vmem:[%s5553_s11 + $0x68] sm:$0xff] }
 0x789   :  { %1683 = vadd.xlane.f32.xlu0 %v1682_v4  ;;  %v1731_v4 = vld [vmem:[%s5553_s11 + $0x28] sm:$0xff] }
 0x78a   :  { %v1685_v35 = vsel %vm84_vm1, %v1679_v6, 0.0 }
 0x78b   :  { %1686 = vadd.xlane.f32.xlu1 %v1685_v35  ;;  %v3884_v35 = vcombine.low %v1745_v58, %v1753_v59  ;;  %v4422_v58 = vld [vmem:[%s5555_s13 + $0xa8] sm:$0xff]   ;;  %v4423_v59 = vld [vmem:[%s5555_s13 + $0x70] sm:$0xff]  }
 0x816   :  { %v1684_v7 = vpop.xlane.xlu0 %1683 }
 0x817   :  { %v1689_v8 = vmul.f32 0.03125, %v1684_v7 }
 0x818   :  { %v1687_v9 = vpop.xlane.xlu1 %1686 }
 0x819   :  { %v1691_v10 = vsub.f32 %v1678_v3, %v1689_v8  ;;  %v1690_v11 = vmul.f32 0.03125, %v1687_v9  ;;  %v1738_v3 = vld [vmem:[%s5553_s11 + $0x60] sm:$0xff]  ;;  %v3873_v8 = vcombine.high %v1731_v4, %v1739_v5 }
 0x81a   :  { %v3871_v7 = vcombine.high %v1730_v62, %v1738_v3  ;;  %v1746_v9 = vld [vmem:[%s5553_s11 + $0xa0] sm:$0xff] }
 0x81b   :  { %v1692_v12 = vsub.f32 %v1679_v6, %v1690_v11  ;;  %v1693_v13 = vmul.f32 %v1691_v10, %v1691_v10  ;;  %v3882_v6 = vcombine.low %v1744_v56, %v1752_v57  ;;  %v1747_v11 = vld [vmem:[%s5553_s11 + $0xa8] sm:$0xff] }
 0x81c   :  { %v4420_v56 = vld [vmem:[%s5555_s13 + $0xe8] sm:$0xff]  }
 0x81d   :  { %v1695_v14 = vsel %vm84_vm1, %v1693_v13, 0.0  ;;  %v1694_v15 = vmul.f32 %v1692_v12, %v1692_v12  ;;  %v3870_v13 = vcombine.low %v1730_v62, %v1738_v3  ;;  %v4421_v57 = vld [vmem:[%s5555_s13 + $0x28] sm:$0xff]   ;;  %v4427_v62 = vld [vmem:[%s5555_s13 + $0x78] sm:$0xff]  }
 0x81e   :  { %1696 = vadd.xlane.f32.xlu0 %v1695_v14  ;;  %v3872_v14 = vcombine.low %v1731_v4, %v1739_v5  ;;  %v4428_v3 = vld [vmem:[%s5555_s13 + $0xf8] sm:$0xff]  }
 0x81f   :  { %v1698_v16 = vsel %vm84_vm1, %v1694_v15, 0.0  ;;  %v4429_v4 = vld [vmem:[%s5555_s13 + $0x38] sm:$0xff]  }
 0x820   :  { %v4430_v5 = vld [vmem:[%s5555_s13 + $0xb8] sm:$0xff]  }
 0x822   :  { %1699 = vadd.xlane.f32.xlu0 %v1698_v16 }
 0x8ab   :  { %v1697_v1 = vpop.xlane.xlu0 %1696 }
 0x8ac   :  { %v1701_v43 = vmul.f32 0.03125, %v1697_v1  ;;  %v4406_v1 = vld [vmem:[%s5555_s13 + $0x88] sm:$0xff]  }
 0x8ae   :  { %v1703_v44 = vadd.f32 1e-05, %v1701_v43  ;;  %v4407_v43 = vld [vmem:[%s5555_s13 + $0x50] sm:$0xff]  }
 0x8af   :  { %v1700_v45 = vpop.xlane.xlu0 %1699 }
 0x8b0   :  { %4559 = vrsqrt.f32 %v1703_v44  ;;  %v1702_v46 = vmul.f32 0.03125, %v1700_v45  ;;  %v4408_v44 = vld [vmem:[%s5555_s13 + $0xd0] sm:$0xff]  }
 0x8b1   :  { %v4409_v45 = vld [vmem:[%s5555_s13 + $0x10] sm:$0xff]  }
 0x8b2   :  { %v1704_v47 = vadd.f32 1e-05, %v1702_v46  ;;  %v4410_v46 = vld [vmem:[%s5555_s13 + $0x90] sm:$0xff]  }
 0x8b4   :  { %4561 = vrsqrt.f32 %v1704_v47  ;;  %v4411_v47 = vld [vmem:[%s5555_s13 + $0x58] sm:$0xff]  }
 0x8ba   :  { %v4560_v48 = vpop.eup %4559 }
 0x8bb   :  { %v1707_v49 = vmul.f32 %v4560_v48, %v1691_v10  ;;  %v1754_v10 = vld [vmem:[%s5553_s11 + $0xe0] sm:$0xff]  ;;  %v4412_v48 = vld [vmem:[%s5555_s13 + $0xd8] sm:$0xff]  }
 0x8bc   :  { %v3887_v15 = vcombine.high %v1746_v9, %v1754_v10  ;;  %v3886_v20 = vcombine.low %v1746_v9, %v1754_v10  ;;  %v5156_v10 = vld [vmem:[%s5554_s12 + $0x8] sm:$0xff] }
 0x8bd   :  { %v1715_v52 = vmul.f32 %v3860_v50, %v1707_v49  ;;  %v4413_v49 = vld [vmem:[%s5555_s13 + $0x18] sm:$0xff]  }
 0x8be   :  { %v4562_v51 = vpop.eup %4561 }
 0x8bf   :  { %v1708_v53 = vmul.f32 %v4562_v51, %v1692_v12  ;;  %v4970_v60 = vadd.f32 %v3861_v54, %v1715_v52  ;;  %v1755_v12 = vld [vmem:[%s5553_s11 + $0xe8] sm:$0xff]  ;;  %v4415_v51 = vld [vmem:[%s5555_s13 + $0x60] sm:$0xff]  }
 0x8c0   :  { %v3889_v16 = vcombine.high %v1747_v11, %v1755_v12  ;;  %v3888_v21 = vcombine.low %v1747_v11, %v1755_v12  ;;  %v4416_v52 = vld [vmem:[%s5555_s13 + $0xe0] sm:$0xff]  }
 0x8c1   :  { %v1716_v55 = vmul.f32 %v3860_v50, %v1708_v53  ;;  %v4414_v50 = vld [vmem:[%s5555_s13 + $0x98] sm:$0xff]   ;;  %v4417_v53 = vld [vmem:[%s5555_s13 + $0x20] sm:$0xff]  }
 0x8c3   :  { %v4972_v61 = vadd.f32 %v3861_v54, %v1716_v55  ;;  %v4418_v54 = vld [vmem:[%s5555_s13 + $0xa0] sm:$0xff]   ;;  %v4419_v55 = vld [vmem:[%s5555_s13 + $0x68] sm:$0xff]  }
 0x8c5   :  { %v4976_v63 = vpack.c.bf16 %v4972_v61, %v4970_v60 }
 0x8c7   :  { %3894 = vmatmul.mubr.msk.bf16.vlgmr.msra.gmra.mrb[24].mxu1 %vm84_vm1, %v4976_v63  ;;  %3895 = vmatmul.mubr.msk.bf16.vlgmr.msra.gmra.mrb[24].mxu0 %vm84_vm1, %v4976_v63 }
 0x8c8   :  { %2092 = vmatpush1.bf16.msra.mxu1 %v3866_v40  ;;  %2135 = vmatpush1.bf16.msra.mxu0 %v3868_v41  ;;  %v4402_v40 = vld [vmem:[%s5555_s13 + $0x80] sm:$0xff]   ;;  %v4403_v41 = vld [vmem:[%s5555_s13 + $0x48] sm:$0xff]  }
 0x8c9   :  { %2093 = vmatprep.subr.bf16.mxu1 %v3883_v0  ;;  %2136 = vmatprep.subr.bf16.mxu0 %v3885_v2  ;;  %v4425_v0 = vld [vmem:[%s5555_s13 + $0x30] sm:$0xff]  }
 0x8ca   :  { %2123 = vmatprep.mubr.bf16.mxu1 %v4601_v36  ;;  %2166 = vmatprep.mubr.bf16.mxu0 %v4601_v36  ;;  %v4426_v2 = vld [vmem:[%s5555_s13 + $0xb0] sm:$0xff]  }
 0x8cc   :  { %2094 = vmatpush1.bf16.msra.mxu1 %v3882_v6  ;;  %2137 = vmatpush1.bf16.msra.mxu0 %v3884_v35  ;;  %v4431_v6 = vld [vmem:[%s5555_s13 + $0x140] sm:$0xff]  }
 0x8cd   :  { %2177 = vmatprep.subr.bf16.mxu1 %v3871_v7  ;;  %2220 = vmatprep.subr.bf16.mxu0 %v3873_v8  ;;  %v4432_v35 = vld [vmem:[%s5555_s13 + $0x1c0] sm:$0xff]   ;;  %v1762_v7 = vlaneseq }
 0x8cf   :  { %3896 = vmatmul.mubr.msk.bf16.vlgmr.msra.gmra.mrb[28].mxu1 %vm84_vm1, %v4976_v63  ;;  %3897 = vmatmul.mubr.msk.bf16.vlgmr.msra.gmra.mrb[28].mxu0 %vm84_vm1, %v4976_v63  ;;  %v5150_v8 = vshrl.u32 %v1762_v7, 7 }
 0x8d0   :  { %2178 = vmatpush1.bf16.msra.mxu1 %v3870_v13  ;;  %2221 = vmatpush1.bf16.msra.mxu0 %v3872_v14  ;;  %v1758_v14 = vld [vmem:[%s5554_s12] sm:$0xff] }
 0x8d1   :  { %2179 = vmatprep.subr.bf16.mxu1 %v3887_v15  ;;  %2222 = vmatprep.subr.bf16.mxu0 %v3889_v16  ;;  %v1788_v9 = vsub.s32 6, %v5150_v8  ;;  %v1764_v12 = vsub.s32 0, %v5150_v8  ;;  %v1772_v13 = vsub.s32 2, %v5150_v8  ;;  %v1768_v15 = vsub.s32 1, %v5150_v8 }
 0x8d2   :  { %2209 = vmatprep.mubr.bf16.mxu1 %v4601_v36  ;;  %2252 = vmatprep.mubr.bf16.mxu0 %v4601_v36  ;;  %v1776_v16 = vsub.s32 3, %v5150_v8  ;;  %v1792_v24 = vsub.s32 7, %v5150_v8 }
 0x8d3   :  { %v5159_v11 = vrot.slane %v5156_v10, %v1788_v9  ;;  %v1765_v17 = vrot.slane %v1758_v14, %v1764_v12  ;;  %v1773_v38 = vrot.slane %v1758_v14, %v1772_v13  ;;  %v1769_v18 = vrot.slane %v1758_v14, %v1768_v15 }
 0x8d4   :  { %2180 = vmatpush1.bf16.msra.mxu1 %v3886_v20  ;;  %2223 = vmatpush1.bf16.msra.mxu0 %v3888_v21  ;;  %v1777_v19 = vrot.slane %v1758_v14, %v1776_v16  ;;  %v1780_v20 = vsub.s32 4, %v5150_v8 }
 0x8d5   :  { %2263 = vmatprep.subr.bf16.mxu1 %v3875_v22  ;;  %2306 = vmatprep.subr.bf16.mxu0 %v3877_v23  ;;  %v1784_v23 = vsub.s32 5, %v5150_v8 }
 0x8d7   :  { %3898 = vmatmul.mubr.msk.bf16.vlgmr.msra.gmra.mrb[32].mxu1 %vm84_vm1, %v4976_v63  ;;  %3899 = vmatmul.mubr.msk.bf16.vlgmr.msra.gmra.mrb[32].mxu0 %vm84_vm1, %v4976_v63 }
 0x8d8   :  { %2264 = vmatpush1.bf16.msra.mxu1 %v3874_v28  ;;  %2307 = vmatpush1.bf16.msra.mxu0 %v3876_v29 }
 0x8d9   :  { %2265 = vmatprep.subr.bf16.mxu1 %v3891_v30  ;;  %2308 = vmatprep.subr.bf16.mxu0 %v3893_v31 }
 0x8da   :  { %2295 = vmatprep.mubr.bf16.mxu1 %v4601_v36  ;;  %2338 = vmatprep.mubr.bf16.mxu0 %v4601_v36  ;;  %v4404_v36 = vld [vmem:[%s5555_s13 + $0xc8] sm:$0xff]  }
 0x8dc   :  { %2266 = vmatpush1.bf16.msra.mxu1 %v3890_v32  ;;  %2309 = vmatpush1.bf16.msra.mxu0 %v3892_v33 }
 0x8dd   :  { %4077 = vmatprep.subr.bf16.mxu1 %v4399_v34  ;;  %4099 = vmatprep.subr.bf16.mxu0 %v4400_v37 }
 0x8df   :  { %3900 = vmatmul.mubr.msk.bf16.vlgmr.msra.gmra.mrb[36].mxu1 %vm84_vm1, %v4976_v63  ;;  %3901 = vmatmul.mubr.msk.bf16.vlgmr.msra.gmra.mrb[36].mxu0 %vm84_vm1, %v4976_v63  ;;  %v4424_v63 = vld [vmem:[%s5555_s13 + $0xf0] sm:$0xff]  }
 0x8e0   :  { %4078 = vmatpush3.bf16.msra.mxu1 %v4401_v39  ;;  %4100 = vmatpush3.bf16.msra.mxu0 %v4402_v40  ;;  %v1781_v40 = vrot.slane %v1758_v14, %v1780_v20 }
 0x8e1   :  { %4079 = vmatprep.subr.bf16.mxu1 %v4403_v41  ;;  %4101 = vmatprep.subr.bf16.mxu0 %v4404_v36  ;;  %v1789_v41 = vrot.slane %v1758_v14, %v1788_v9 }
 0x8e4   :  { %4080 = vmatpush3.bf16.msra.mxu1 %v4405_v42  ;;  %4102 = vmatpush3.bf16.msra.mxu0 %v4406_v1  ;;  %v1785_v1 = vrot.slane %v1758_v14, %v1784_v23 }
 0x8e5   :  { %4081 = vmatprep.subr.bf16.mxu1 %v4407_v43  ;;  %4103 = vmatprep.subr.bf16.mxu0 %v4408_v44  ;;  %v1793_v43 = vrot.slane %v1758_v14, %v1792_v24  ;;  %v1805_v14 = vrot.slane %v5156_v10, %v1772_v13  ;;  %v4438_v13 = vld [vmem:[%s5555_s13 + $0x188] sm:$0xff]  }
 0x8e8   :  { %4082 = vmatpush3.bf16.msra.mxu1 %v4409_v45  ;;  %4104 = vmatpush3.bf16.msra.mxu0 %v4410_v46 }
 0x8e9   :  { %4083 = vmatprep.subr.bf16.mxu1 %v4411_v47  ;;  %4105 = vmatprep.subr.bf16.mxu0 %v4412_v48 }
 0x8ec   :  { %4084 = vmatpush3.bf16.msra.mxu1 %v4413_v49  ;;  %4106 = vmatpush3.bf16.msra.mxu0 %v4414_v50 }
 0x8ed   :  { %4085 = vmatprep.subr.bf16.mxu1 %v4415_v51  ;;  %4107 = vmatprep.subr.bf16.mxu0 %v4416_v52 }
 0x8f0   :  { %4086 = vmatpush3.bf16.msra.mxu1 %v4417_v53  ;;  %4108 = vmatpush3.bf16.msra.mxu0 %v4418_v54 }
 0x8f1   :  { %4087 = vmatprep.subr.bf16.mxu1 %v4419_v55  ;;  %4109 = vmatprep.subr.bf16.mxu0 %v4420_v56 }
 0x8f4   :  { %4088 = vmatpush3.bf16.msra.mxu1 %v4421_v57  ;;  %4110 = vmatpush3.bf16.msra.mxu0 %v4422_v58  ;;  %v4433_v58 = vld [vmem:[%s5555_s13 + $0x100] sm:$0xff]  }
 0x8f5   :  { %4089 = vmatprep.subr.bf16.mxu1 %v4423_v59  ;;  %4111 = vmatprep.subr.bf16.mxu0 %v4424_v63  ;;  %v4434_v59 = vld [vmem:[%s5555_s13 + $0x180] sm:$0xff]  }
 0x8f8   :  { %4090 = vmatpush3.bf16.msra.mxu1 %v4425_v0  ;;  %4112 = vmatpush3.bf16.msra.mxu0 %v4426_v2 }
 0x8f9   :  { %4091 = vmatprep.subr.bf16.mxu1 %v4427_v62  ;;  %4113 = vmatprep.subr.bf16.mxu0 %v4428_v3  ;;  %v4435_v3 = vld [vmem:[%s5555_s13 + $0x148] sm:$0xff]  }
 0x8fc   :  { %4092 = vmatpush3.bf16.msra.mxu1 %v4429_v4  ;;  %4114 = vmatpush3.bf16.msra.mxu0 %v4430_v5  ;;  %v4436_v4 = vld [vmem:[%s5555_s13 + $0x1c8] sm:$0xff]   ;;  %v1797_v5 = vrot.slane %v5156_v10, %v1764_v12 }
 0x8fd   :  { %4121 = vmatprep.subr.bf16.mxu1 %v4431_v6  ;;  %4143 = vmatprep.subr.bf16.mxu0 %v4432_v35 }
 0x99a   :  { %v2039_v21 = vpop.f32.mrb[24].mxu1  ;;  %v2082_v22 = vpop.f32.mrb[24].mxu0 }
 0x99b   :  { %v2040_v25 = vadd.f32 %v2039_v21, %v1765_v17  ;;  %v2083_v26 = vadd.f32 %v2082_v22, %v1773_v38  ;;  %v2041_v27 = vpop.f32.mrb[25].mxu1  ;;  %v2084_v28 = vpop.f32.mrb[25].mxu0  ;;  %v1801_v21 = vrot.slane %v5156_v10, %v1768_v15 }
 0x99c   :  { %v2042_v29 = vadd.f32 %v2041_v27, %v1769_v18  ;;  %v2085_v30 = vadd.f32 %v2084_v28, %v1777_v19  ;;  %v2043_v31 = vpop.f32.mrb[26].mxu1  ;;  %v2086_v32 = vpop.f32.mrb[26].mxu0 }
 0x99d   :  { %v2044_v33 = vadd.f32 %v2043_v31, %v1765_v17  ;;  %v2087_v34 = vadd.f32 %v2086_v32, %v1773_v38  ;;  %v2045_v37 = vpop.f32.mrb[27].mxu1  ;;  %v2088_v39 = vpop.f32.mrb[27].mxu0  ;;  %v2349_v44 = vmax.f32 %v2040_v25, 0.0  ;;  %v2351_v45 = vmax.f32 %v2083_v26, 0.0  ;;  %v4437_v25 = vld [vmem:[%s5555_s13 + $0x108] sm:$0xff]   ;;  %v4440_v31 = vld [vmem:[%s5555_s13 + $0x1d0] sm:$0xff]  }
 0x99e   :  { %v2046_v36 = vadd.f32 %v2045_v37, %v1769_v18  ;;  %v2089_v42 = vadd.f32 %v2088_v39, %v1777_v19  ;;  %v2350_v48 = vmax.f32 %v2042_v29, 0.0  ;;  %v2352_v49 = vmax.f32 %v2085_v30, 0.0  ;;  %v4439_v30 = vld [vmem:[%s5555_s13 + $0x150] sm:$0xff]  }
 0x99f   :  { %v2365_v46 = vmax.f32 %v2044_v33, 0.0  ;;  %v2367_v47 = vmax.f32 %v2087_v34, 0.0  ;;  %v1809_v26 = vrot.slane %v5156_v10, %v1776_v16 }
 0x9a0   :  { %v2366_v50 = vmax.f32 %v2046_v36, 0.0  ;;  %v2368_v51 = vmax.f32 %v2089_v42, 0.0 }
 0x9a1   :  { %v2381_v52 = vpack.c.bf16 %v2365_v46, %v2349_v44  ;;  %v2383_v53 = vpack.c.bf16 %v2367_v47, %v2351_v45 }
 0x9a2   :  { %v2382_v54 = vpack.c.bf16 %v2366_v50, %v2350_v48  ;;  %v2384_v55 = vpack.c.bf16 %v2368_v51, %v2352_v49  ;;  %v2125_v56 = vpop.f32.mrb[28].mxu1  ;;  %v2168_v57 = vpop.f32.mrb[28].mxu0  ;;  %v4443_v48 = vld [vmem:[%s5555_s13 + $0x158] sm:$0xff]  }
 0x9a3   :  { %v2126_v63 = vadd.f32 %v2125_v56, %v1781_v40  ;;  %v2169_v0 = vadd.f32 %v2168_v57, %v1789_v41  ;;  %v2127_v2 = vpop.f32.mrb[29].mxu1  ;;  %v2170_v62 = vpop.f32.mrb[29].mxu0  ;;  %v4444_v49 = vld [vmem:[%s5555_s13 + $0x1d8] sm:$0xff]  }
 0x9a4   :  { %v2128_v6 = vadd.f32 %v2127_v2, %v1785_v1  ;;  %v2171_v35 = vadd.f32 %v2170_v62, %v1793_v43  ;;  %v2129_v7 = vpop.f32.mrb[30].mxu1  ;;  %v2172_v9 = vpop.f32.mrb[30].mxu0  ;;  %3460 = vmatprep.mubr.bf16.mxu1 %v2382_v54  ;;  %3501 = vmatprep.mubr.bf16.mxu0 %v2384_v55  ;;  %v4445_v2 = vld [vmem:[%s5555_s13 + $0x118] sm:$0xff]  }
 0x9a5   :  { %v2130_v17 = vadd.f32 %v2129_v7, %v1781_v40  ;;  %v2173_v38 = vadd.f32 %v2172_v9, %v1789_v41  ;;  %v2131_v18 = vpop.f32.mrb[31].mxu1  ;;  %v2174_v19 = vpop.f32.mrb[31].mxu0  ;;  %3461 = vmatmul.mubr.bf16.vlgmr.msra.gmra.mrb[40].mxu1 %v2381_v52  ;;  %3502 = vmatmul.mubr.bf16.vlgmr.msra.gmra.mrb[40].mxu0 %v2383_v53  ;;  %v2353_v27 = vmax.f32 %v2126_v63, 0.0  ;;  %v2355_v28 = vmax.f32 %v2169_v0, 0.0  ;;  %v4446_v62 = vld [vmem:[%s5555_s13 + $0x198] sm:$0xff]  }
 0x9a6   :  { %v2132_v22 = vadd.f32 %v2131_v18, %v1785_v1  ;;  %v2175_v12 = vadd.f32 %v2174_v19, %v1793_v43  ;;  %4122 = vmatpush3.bf16.msra.mxu1 %v4433_v58  ;;  %4144 = vmatpush3.bf16.msra.mxu0 %v4434_v59  ;;  %v2354_v32 = vmax.f32 %v2128_v6, 0.0  ;;  %v2356_v33 = vmax.f32 %v2171_v35, 0.0  ;;  %v4441_v1 = vld [vmem:[%s5555_s13 + $0x110] sm:$0xff]   ;;  %v4447_v6 = vld [vmem:[%s5555_s13 + $0x160] sm:$0xff]  }
 0x9a7   :  { %v2369_v29 = vmax.f32 %v2130_v17, 0.0  ;;  %v2371_v15 = vmax.f32 %v2173_v38, 0.0  ;;  %4123 = vmatprep.subr.bf16.mxu1 %v4435_v3  ;;  %4145 = vmatprep.subr.bf16.mxu0 %v4436_v4  ;;  %v4442_v43 = vld [vmem:[%s5555_s13 + $0x190] sm:$0xff]   ;;  %v1813_v58 = vrot.slane %v5156_v10, %v1780_v20  ;;  %v1817_v59 = vrot.slane %v5156_v10, %v1784_v23  ;;  %v4448_v35 = vld [vmem:[%s5555_s13 + $0x1e0] sm:$0xff]  }
 0x9a8   :  { %v2370_v34 = vmax.f32 %v2132_v22, 0.0  ;;  %v2372_v37 = vmax.f32 %v2175_v12, 0.0  ;;  %v1825_v20 = vrot.slane %v5156_v10, %v1792_v24  ;;  %v4450_v22 = vld [vmem:[%s5555_s13 + $0x1a0] sm:$0xff]  }
 0x9a9   :  { %v5213_v39 = vpack.c.bf16 %v2369_v29, %v2353_v27  ;;  %v5215_v16 = vpack.c.bf16 %v2371_v15, %v2355_v28  ;;  %v4451_v27 = vld [vmem:[%s5555_s13 + $0x168] sm:$0xff]  }
 0x9aa   :  { %v2386_v40 = vpack.c.bf16 %v2370_v34, %v2354_v32  ;;  %v2388_v41 = vpack.c.bf16 %v2372_v37, %v2356_v33  ;;  %4124 = vmatpush3.bf16.msra.mxu1 %v4437_v25  ;;  %4146 = vmatpush3.bf16.msra.mxu0 %v4438_v13  ;;  %v2211_v36 = vpop.f32.mrb[32].mxu1  ;;  %v2254_v42 = vpop.f32.mrb[32].mxu0  ;;  %v4452_v28 = vld [vmem:[%s5555_s13 + $0x1e8] sm:$0xff]  }
 0x9ab   :  { %v2212_v44 = vadd.f32 %v2211_v36, %v1797_v5  ;;  %v2255_v45 = vadd.f32 %v2254_v42, %v1805_v14  ;;  %v2213_v46 = vpop.f32.mrb[33].mxu1  ;;  %v2256_v47 = vpop.f32.mrb[33].mxu0  ;;  %4125 = vmatprep.subr.bf16.mxu1 %v4439_v30  ;;  %4147 = vmatprep.subr.bf16.mxu0 %v4440_v31  ;;  %v4453_v36 = vld [vmem:[%s5555_s13 + $0x128] sm:$0xff]  }
 0x9ac   :  { %v2214_v50 = vadd.f32 %v2213_v46, %v1801_v21  ;;  %v2257_v51 = vadd.f32 %v2256_v47, %v1809_v26  ;;  %v2215_v52 = vpop.f32.mrb[34].mxu1  ;;  %v2258_v53 = vpop.f32.mrb[34].mxu0  ;;  %3542 = vmatprep.mubr.bf16.mxu1 %v2386_v40  ;;  %3583 = vmatprep.mubr.bf16.mxu0 %v2388_v41  ;;  %v4454_v42 = vld [vmem:[%s5555_s13 + $0x1a8] sm:$0xff]   ;;  %v4456_v46 = vld [vmem:[%s5555_s13 + $0x1f0] sm:$0xff]  }
 0x9ad   :  { %v2216_v54 = vadd.f32 %v2215_v52, %v1797_v5  ;;  %v2259_v55 = vadd.f32 %v2258_v53, %v1805_v14  ;;  %v2217_v56 = vpop.f32.mrb[35].mxu1  ;;  %v2260_v57 = vpop.f32.mrb[35].mxu0  ;;  %v2357_v3 = vmax.f32 %v2212_v44, 0.0  ;;  %v2359_v4 = vmax.f32 %v2255_v45, 0.0 }
 0x9ae   :  { %v2218_v63 = vadd.f32 %v2217_v56, %v1801_v21  ;;  %v2261_v0 = vadd.f32 %v2260_v57, %v1809_v26  ;;  %4126 = vmatpush3.bf16.msra.mxu1 %v4441_v1  ;;  %4148 = vmatpush3.bf16.msra.mxu0 %v4442_v43  ;;  %v2358_v7 = vmax.f32 %v2214_v50, 0.0  ;;  %v2360_v9 = vmax.f32 %v2257_v51, 0.0  ;;  %v4449_v21 = vld [vmem:[%s5555_s13 + $0x120] sm:$0xff]   ;;  %v4458_v56 = vld [vmem:[%s5555_s13 + $0x1b0] sm:$0xff]   ;;  %v4459_v57 = vld [vmem:[%s5555_s13 + $0x178] sm:$0xff]  }
 0x9af   :  { %v2373_v5 = vmax.f32 %v2216_v54, 0.0  ;;  %v2375_v23 = vmax.f32 %v2259_v55, 0.0  ;;  %4127 = vmatprep.subr.bf16.mxu1 %v4443_v48  ;;  %4149 = vmatprep.subr.bf16.mxu0 %v4444_v49  ;;  %v4457_v55 = vld [vmem:[%s5555_s13 + $0x130] sm:$0xff]  }
 0x9b0   :  { %v2374_v14 = vmax.f32 %v2218_v63, 0.0  ;;  %v2376_v8 = vmax.f32 %v2261_v0, 0.0  ;;  %v4462_v63 = vld [vmem:[%s5555_s13 + $0x1b8] sm:$0xff]   ;;  %v4463_v0 = vld [vmem:[%s5555_s13 + $0x240] sm:$0xff]  }
 0x9b1   :  { %v5250_v17 = vpack.c.bf16 %v2373_v5, %v2357_v3  ;;  %v5252_v10 = vpack.c.bf16 %v2375_v23, %v2359_v4  ;;  %v4467_v3 = vld [vmem:[%s5555_s13 + $0x248] sm:$0xff]  }
 0x9b2   :  { %v5254_v24 = vpack.c.bf16 %v2374_v14, %v2358_v7  ;;  %v5256_v38 = vpack.c.bf16 %v2376_v8, %v2360_v9  ;;  %4128 = vmatpush3.bf16.msra.mxu1 %v4445_v2  ;;  %4150 = vmatpush3.bf16.msra.mxu0 %v4446_v62  ;;  %v2297_v18 = vpop.f32.mrb[36].mxu1  ;;  %v2340_v19 = vpop.f32.mrb[36].mxu0  ;;  %v4464_v2 = vld [vmem:[%s5555_s13 + $0x2c0] sm:$0xff]   ;;  %v4468_v4 = vld [vmem:[%s5555_s13 + $0x2c8] sm:$0xff]   ;;  %v4475_v7 = vld [vmem:[%s5555_s13 + $0x258] sm:$0xff]  }
 0x9b3   :  { %v2298_v12 = vadd.f32 %v2297_v18, %v1813_v58  ;;  %v2341_v25 = vadd.f32 %v2340_v19, %v5159_v11  ;;  %v2299_v13 = vpop.f32.mrb[37].mxu1  ;;  %v2342_v26 = vpop.f32.mrb[37].mxu0  ;;  %4129 = vmatprep.subr.bf16.mxu1 %v4447_v6  ;;  %4151 = vmatprep.subr.bf16.mxu0 %v4448_v35  ;;  %v4465_v62 = vld [vmem:[%s5555_s13 + $0x200] sm:$0xff]   ;;  %v4469_v5 = vld [vmem:[%s5555_s13 + $0x208] sm:$0xff]   ;;  %v4473_v6 = vld [vmem:[%s5555_s13 + $0x210] sm:$0xff]  }
 0x9b4   :  { %v2300_v29 = vadd.f32 %v2299_v13, %v1817_v59  ;;  %v2343_v15 = vadd.f32 %v2342_v26, %v1825_v20  ;;  %v2301_v30 = vpop.f32.mrb[38].mxu1  ;;  %v2344_v31 = vpop.f32.mrb[38].mxu0  ;;  %v4470_v23 = vld [vmem:[%s5555_s13 + $0x288] sm:$0xff]   ;;  %v4474_v35 = vld [vmem:[%s5555_s13 + $0x290] sm:$0xff]   ;;  %v4476_v9 = vld [vmem:[%s5555_s13 + $0x2d8] sm:$0xff]  }
 0x9b5   :  { %v2302_v32 = vadd.f32 %v2301_v30, %v1813_v58  ;;  %v2345_v33 = vadd.f32 %v2344_v31, %v5159_v11  ;;  %v2303_v34 = vpop.f32.mrb[39].mxu1  ;;  %v2346_v37 = vpop.f32.mrb[39].mxu0  ;;  %v2361_v1 = vmax.f32 %v2298_v12, 0.0  ;;  %v2363_v43 = vmax.f32 %v2341_v25, 0.0  ;;  %v4455_v11 = vld [vmem:[%s5555_s13 + $0x170] sm:$0xff]   ;;  %v4460_v58 = vld [vmem:[%s5555_s13 + $0x1f8] sm:$0xff]  }
 0x9b6   :  { %v2304_v40 = vadd.f32 %v2303_v34, %v1817_v59  ;;  %v2347_v41 = vadd.f32 %v2346_v37, %v1825_v20  ;;  %4130 = vmatpush3.bf16.msra.mxu1 %v4449_v21  ;;  %4152 = vmatpush3.bf16.msra.mxu0 %v4450_v22  ;;  %v2362_v47 = vmax.f32 %v2300_v29, 0.0  ;;  %v2364_v48 = vmax.f32 %v2343_v15, 0.0  ;;  %v4461_v59 = vld [vmem:[%s5555_s13 + $0x138] sm:$0xff]   ;;  %v4466_v20 = vld [vmem:[%s5555_s13 + $0x280] sm:$0xff]   ;;  %v4483_v21 = vld [vmem:[%s5555_s13 + $0x268] sm:$0xff]  }
 0x9b7   :  { %v2377_v44 = vmax.f32 %v2302_v32, 0.0  ;;  %v2379_v45 = vmax.f32 %v2345_v33, 0.0  ;;  %4131 = vmatprep.subr.bf16.mxu1 %v4451_v27  ;;  %4153 = vmatprep.subr.bf16.mxu0 %v4452_v28  ;;  %v4477_v14 = vld [vmem:[%s5555_s13 + $0x218] sm:$0xff]   ;;  %v4481_v18 = vld [vmem:[%s5555_s13 + $0x220] sm:$0xff]   ;;  %v4484_v22 = vld [vmem:[%s5555_s13 + $0x2e8] sm:$0xff]  }
 0x9b8   :  { %v2378_v49 = vmax.f32 %v2304_v40, 0.0  ;;  %v2380_v50 = vmax.f32 %v2347_v41, 0.0  ;;  %v4478_v8 = vld [vmem:[%s5555_s13 + $0x298] sm:$0xff]   ;;  %v4482_v19 = vld [vmem:[%s5555_s13 + $0x2a0] sm:$0xff]   ;;  %v4485_v12 = vld [vmem:[%s5555_s13 + $0x228] sm:$0xff]  }
 0x9b9   :  { %v5284_v51 = vpack.c.bf16 %v2377_v44, %v2361_v1  ;;  %v5286_v52 = vpack.c.bf16 %v2379_v45, %v2363_v43  ;;  %v4486_v25 = vld [vmem:[%s5555_s13 + $0x2a8] sm:$0xff]   ;;  %v4487_v13 = vld [vmem:[%s5555_s13 + $0x270] sm:$0xff]   ;;  %v4491_v29 = vld [vmem:[%s5555_s13 + $0x278] sm:$0xff]  }
 0x9ba   :  { %v5288_v53 = vpack.c.bf16 %v2378_v49, %v2362_v47  ;;  %v5290_v54 = vpack.c.bf16 %v2380_v50, %v2364_v48  ;;  %4132 = vmatpush3.bf16.msra.mxu1 %v4453_v36  ;;  %4154 = vmatpush3.bf16.msra.mxu0 %v4454_v42  ;;  %v4488_v26 = vld [vmem:[%s5555_s13 + $0x2f0] sm:$0xff]   ;;  %v4492_v15 = vld [vmem:[%s5555_s13 + $0x2f8] sm:$0xff]   ;;  %v4495_v32 = vld [vmem:[%s5555_s13 + $0x340] sm:$0xff]  }
 0x9bb   :  { %4133 = vmatprep.subr.bf16.mxu1 %v4455_v11  ;;  %4155 = vmatprep.subr.bf16.mxu0 %v4456_v46  ;;  %v4489_v27 = vld [vmem:[%s5555_s13 + $0x230] sm:$0xff]   ;;  %v4493_v30 = vld [vmem:[%s5555_s13 + $0x238] sm:$0xff]   ;;  %v4496_v33 = vld [vmem:[%s5555_s13 + $0x3c0] sm:$0xff]  }
 0x9bc   :  { %v4490_v28 = vld [vmem:[%s5555_s13 + $0x2b0] sm:$0xff]   ;;  %v4494_v31 = vld [vmem:[%s5555_s13 + $0x2b8] sm:$0xff]   ;;  %v4497_v34 = vld [vmem:[%s5555_s13 + $0x300] sm:$0xff]  }
 0x9bd   :  { %v4498_v37 = vld [vmem:[%s5555_s13 + $0x380] sm:$0xff]   ;;  %v4499_v40 = vld [vmem:[%s5555_s13 + $0x348] sm:$0xff]   ;;  %v4505_v1 = vld [vmem:[%s5555_s13 + $0x310] sm:$0xff]  }
 0x9be   :  { %4134 = vmatpush3.bf16.msra.mxu1 %v4457_v55  ;;  %4156 = vmatpush3.bf16.msra.mxu0 %v4458_v56  ;;  %v4500_v41 = vld [vmem:[%s5555_s13 + $0x3c8] sm:$0xff]   ;;  %v4506_v43 = vld [vmem:[%s5555_s13 + $0x390] sm:$0xff]   ;;  %v4507_v44 = vld [vmem:[%s5555_s13 + $0x358] sm:$0xff]  }
 0x9bf   :  { %4135 = vmatprep.subr.bf16.mxu1 %v4459_v57  ;;  %4157 = vmatprep.subr.bf16.mxu0 %v4460_v58  ;;  %v4501_v36 = vld [vmem:[%s5555_s13 + $0x308] sm:$0xff]   ;;  %v4508_v45 = vld [vmem:[%s5555_s13 + $0x3d8] sm:$0xff]   ;;  %v4511_v47 = vld [vmem:[%s5555_s13 + $0x360] sm:$0xff]  }
 0x9c0   :  { %v4502_v42 = vld [vmem:[%s5555_s13 + $0x388] sm:$0xff]   ;;  %v4509_v11 = vld [vmem:[%s5555_s13 + $0x318] sm:$0xff]   ;;  %v4512_v48 = vld [vmem:[%s5555_s13 + $0x3e0] sm:$0xff]  }
 0x9c1   :  { %v4510_v46 = vld [vmem:[%s5555_s13 + $0x398] sm:$0xff]   ;;  %v4513_v49 = vld [vmem:[%s5555_s13 + $0x320] sm:$0xff]   ;;  %v4517_v55 = vld [vmem:[%s5555_s13 + $0x328] sm:$0xff]  }
 0x9c2   :  { %4136 = vmatpush3.bf16.msra.mxu1 %v4461_v59  ;;  %4158 = vmatpush3.bf16.msra.mxu0 %v4462_v63  ;;  %v4514_v50 = vld [vmem:[%s5555_s13 + $0x3a0] sm:$0xff]   ;;  %v4518_v56 = vld [vmem:[%s5555_s13 + $0x3a8] sm:$0xff]   ;;  %v4519_v57 = vld [vmem:[%s5555_s13 + $0x370] sm:$0xff]  }
 0x9c3   :  { %4165 = vmatprep.subr.bf16.mxu1 %v4463_v0  ;;  %4187 = vmatprep.subr.bf16.mxu0 %v4464_v2  ;;  %v4520_v58 = vld [vmem:[%s5555_s13 + $0x3f0] sm:$0xff]   ;;  %v4523_v0 = vld [vmem:[%s5555_s13 + $0x378] sm:$0xff]  }
 0x9c4   :  { %v4521_v59 = vld [vmem:[%s5555_s13 + $0x330] sm:$0xff]   ;;  %v4524_v2 = vld [vmem:[%s5555_s13 + $0x3f8] sm:$0xff]  }
 0x9c5   :  { %3543 = vmatmul.mubr.bf16.vlgmr.msra.gmra.mrb[44].mxu1 %v5213_v39  ;;  %3584 = vmatmul.mubr.bf16.vlgmr.msra.gmra.mrb[44].mxu0 %v5215_v16  ;;  %v4471_v39 = vld [vmem:[%s5555_s13 + $0x250] sm:$0xff]  }
 0x9c6   :  { %4166 = vmatpush3.bf16.msra.mxu1 %v4465_v62  ;;  %3624 = vmatprep.mubr.bf16.mxu1 %v5254_v24  ;;  %v4472_v16 = vld [vmem:[%s5555_s13 + $0x2d0] sm:$0xff]   ;;  %v4479_v24 = vld [vmem:[%s5555_s13 + $0x260] sm:$0xff]   ;;  %v4525_v62 = vld [vmem:[%s5555_s13 + $0x338] sm:$0xff]  }
 0x9c7   :  { %4188 = vmatpush3.bf16.msra.mxu0 %v4466_v20  ;;  %3665 = vmatprep.mubr.bf16.mxu0 %v5256_v38  ;;  %v4480_v38 = vld [vmem:[%s5555_s13 + $0x2e0] sm:$0xff]   ;;  %v4522_v63 = vld [vmem:[%s5555_s13 + $0x3b0] sm:$0xff]   ;;  %v4526_v20 = vld [vmem:[%s5555_s13 + $0x3b8] sm:$0xff]  }
 0x9c8   :  { %4167 = vmatprep.subr.bf16.mxu1 %v4467_v3  ;;  %4189 = vmatprep.subr.bf16.mxu0 %v4468_v4 }
 0x9ca   :  { %4168 = vmatpush3.bf16.msra.mxu1 %v4469_v5  ;;  %v3902_v5 = vld [vmem:[%s5556_s14] ss:$0 sm:$0xff] }
 0x9cb   :  { %4190 = vmatpush3.bf16.msra.mxu0 %v4470_v23  ;;  %4169 = vmatprep.subr.bf16.mxu1 %v4471_v39 }
 0x9cc   :  { %4191 = vmatprep.subr.bf16.mxu0 %v4472_v16 }
 0x9ce   :  { %4170 = vmatpush3.bf16.msra.mxu1 %v4473_v6 }
 0x9cf   :  { %4192 = vmatpush3.bf16.msra.mxu0 %v4474_v35  ;;  %4171 = vmatprep.subr.bf16.mxu1 %v4475_v7 }
 0x9d0   :  { %4193 = vmatprep.subr.bf16.mxu0 %v4476_v9 }
 0x9d2   :  { %4172 = vmatpush3.bf16.msra.mxu1 %v4477_v14 }
 0x9d3   :  { %4194 = vmatpush3.bf16.msra.mxu0 %v4478_v8  ;;  %4173 = vmatprep.subr.bf16.mxu1 %v4479_v24 }
 0x9d4   :  { %4195 = vmatprep.subr.bf16.mxu0 %v4480_v38 }
 0x9d6   :  { %4174 = vmatpush3.bf16.msra.mxu1 %v4481_v18 }
 0x9d7   :  { %4196 = vmatpush3.bf16.msra.mxu0 %v4482_v19  ;;  %4175 = vmatprep.subr.bf16.mxu1 %v4483_v21 }
 0x9d8   :  { %4197 = vmatprep.subr.bf16.mxu0 %v4484_v22 }
 0x9da   :  { %4176 = vmatpush3.bf16.msra.mxu1 %v4485_v12 }
 0x9db   :  { %4198 = vmatpush3.bf16.msra.mxu0 %v4486_v25  ;;  %4177 = vmatprep.subr.bf16.mxu1 %v4487_v13 }
 0x9dc   :  { %4199 = vmatprep.subr.bf16.mxu0 %v4488_v26 }
 0x9de   :  { %4178 = vmatpush3.bf16.msra.mxu1 %v4489_v27 }
 0x9df   :  { %4200 = vmatpush3.bf16.msra.mxu0 %v4490_v28  ;;  %4179 = vmatprep.subr.bf16.mxu1 %v4491_v29 }
 0x9e0   :  { %4201 = vmatprep.subr.bf16.mxu0 %v4492_v15 }
 0x9e2   :  { %4180 = vmatpush3.bf16.msra.mxu1 %v4493_v30 }
 0x9e3   :  { %4202 = vmatpush3.bf16.msra.mxu0 %v4494_v31  ;;  %4209 = vmatprep.subr.bf16.mxu1 %v4495_v32 }
 0x9e4   :  { %4231 = vmatprep.subr.bf16.mxu0 %v4496_v33 }
 0x9e5   :  { %3625 = vmatmul.mubr.bf16.vlgmr.msra.gmra.mrb[48].mxu1 %v5250_v17  ;;  %v4503_v17 = vld [vmem:[%s5555_s13 + $0x350] sm:$0xff]  }
 0x9e6   :  { %3666 = vmatmul.mubr.bf16.vlgmr.msra.gmra.mrb[48].mxu0 %v5252_v10  ;;  %4210 = vmatpush3.bf16.msra.mxu1 %v4497_v34  ;;  %v4504_v10 = vld [vmem:[%s5555_s13 + $0x3d0] sm:$0xff]  }
 0x9e7   :  { %3706 = vmatprep.mubr.bf16.mxu1 %v5288_v53  ;;  %4232 = vmatpush3.bf16.msra.mxu0 %v4498_v37  ;;  %v4515_v53 = vld [vmem:[%s5555_s13 + $0x368] sm:$0xff]  }
 0x9e8   :  { %3747 = vmatprep.mubr.bf16.mxu0 %v5290_v54  ;;  %4211 = vmatprep.subr.bf16.mxu1 %v4499_v40  ;;  %v4516_v54 = vld [vmem:[%s5555_s13 + $0x3e8] sm:$0xff]  }
 0x9e9   :  { %4233 = vmatprep.subr.bf16.mxu0 %v4500_v41 }
 0x9ea   :  { %4212 = vmatpush3.bf16.msra.mxu1 %v4501_v36 }
 0x9eb   :  { %4234 = vmatpush3.bf16.msra.mxu0 %v4502_v42  ;;  %4213 = vmatprep.subr.bf16.mxu1 %v4503_v17 }
 0x9ec   :  { %4235 = vmatprep.subr.bf16.mxu0 %v4504_v10 }
 0x9ee   :  { %4214 = vmatpush3.bf16.msra.mxu1 %v4505_v1 }
 0x9ef   :  { %4236 = vmatpush3.bf16.msra.mxu0 %v4506_v43  ;;  %4215 = vmatprep.subr.bf16.mxu1 %v4507_v44 }
 0x9f0   :  { %4237 = vmatprep.subr.bf16.mxu0 %v4508_v45 }
 0x9f2   :  { %4216 = vmatpush3.bf16.msra.mxu1 %v4509_v11 }
 0x9f3   :  { %4238 = vmatpush3.bf16.msra.mxu0 %v4510_v46  ;;  %4217 = vmatprep.subr.bf16.mxu1 %v4511_v47 }
 0x9f4   :  { %4239 = vmatprep.subr.bf16.mxu0 %v4512_v48 }
 0x9f6   :  { %4218 = vmatpush3.bf16.msra.mxu1 %v4513_v49 }
 0x9f7   :  { %4240 = vmatpush3.bf16.msra.mxu0 %v4514_v50  ;;  %4219 = vmatprep.subr.bf16.mxu1 %v4515_v53 }
 0x9f8   :  { %4241 = vmatprep.subr.bf16.mxu0 %v4516_v54 }
 0x9fa   :  { %4220 = vmatpush3.bf16.msra.mxu1 %v4517_v55 }
 0x9fb   :  { %4242 = vmatpush3.bf16.msra.mxu0 %v4518_v56  ;;  %4221 = vmatprep.subr.bf16.mxu1 %v4519_v57 }
 0x9fc   :  { %4243 = vmatprep.subr.bf16.mxu0 %v4520_v58 }
 0x9fe   :  { %4222 = vmatpush3.bf16.msra.mxu1 %v4521_v59 }
 0x9ff   :  { %4244 = vmatpush3.bf16.msra.mxu0 %v4522_v63  ;;  %4223 = vmatprep.subr.bf16.mxu1 %v4523_v0 }
 0xa00   :  { %4245 = vmatprep.subr.bf16.mxu0 %v4524_v2 }
 0xa02   :  { %4224 = vmatpush3.bf16.msra.mxu1 %v4525_v62 }
 0xa03   :  { %4246 = vmatpush3.bf16.msra.mxu0 %v4526_v20 }
 0xa05   :  { %3707 = vmatmul.mubr.bf16.vlgmr.msra.gmra.mrb[52].mxu1 %v5284_v51 }
 0xa06   :  { %3748 = vmatmul.mubr.bf16.vlgmr.msra.gmra.mrb[52].mxu0 %v5286_v52 }
 0xa78   :  { %v4093_v3 = vpop.f32.mrb[40].mxu1  ;;  %v4115_v4 = vpop.f32.mrb[40].mxu0 }
 0xa79   :  { %v4094_v23 = vpop.f32.mrb[41].mxu1  ;;  %v4116_v39 = vpop.f32.mrb[41].mxu0 }
 0xa7a   :  { %v4095_v16 = vadd.f32 %v4094_v23, %v4093_v3  ;;  %v4117_v6 = vadd.f32 %v4116_v39, %v4115_v4  ;;  %v4096_v35 = vpop.f32.mrb[42].mxu1  ;;  %v4118_v7 = vpop.f32.mrb[42].mxu0 }
 0xa7b   :  { %v4097_v9 = vpop.f32.mrb[43].mxu1  ;;  %v4119_v14 = vpop.f32.mrb[43].mxu0 }
 0xa7c   :  { %v3463_v8 = vadd.f32 %v4095_v16, %v3902_v5  ;;  %v4098_v24 = vadd.f32 %v4097_v9, %v4096_v35  ;;  %v4120_v38 = vadd.f32 %v4119_v14, %v4118_v7 }
 0xa7e   :  { %v3504_v51 = vadd.f32 %v4117_v6, %v3463_v8  ;;  %v3466_v18 = vadd.f32 %v4098_v24, %v3902_v5 }
 0xa80   :  { %v3507_v52 = vadd.f32 %v4120_v38, %v3466_v18 }
 0xa98   :  { %v4137_v19 = vpop.f32.mrb[44].mxu1  ;;  %v4159_v21 = vpop.f32.mrb[44].mxu0 }
 0xa99   :  { %v4138_v22 = vpop.f32.mrb[45].mxu1  ;;  %v4160_v12 = vpop.f32.mrb[45].mxu0 }
 0xa9a   :  { %v4139_v25 = vadd.f32 %v4138_v22, %v4137_v19  ;;  %v4161_v13 = vadd.f32 %v4160_v12, %v4159_v21  ;;  %v4140_v26 = vpop.f32.mrb[46].mxu1  ;;  %v4162_v27 = vpop.f32.mrb[46].mxu0 }
 0xa9b   :  { %v4141_v28 = vpop.f32.mrb[47].mxu1  ;;  %v4163_v29 = vpop.f32.mrb[47].mxu0 }
 0xa9c   :  { %v3545_v15 = vadd.f32 %v4139_v25, %v3504_v51  ;;  %v4142_v30 = vadd.f32 %v4141_v28, %v4140_v26  ;;  %v4164_v31 = vadd.f32 %v4163_v29, %v4162_v27  ;;  %v4032_v28 = vld [vmem:[%s5558_s16] ss:$0 sm:$0xff] }
 0xa9e   :  { %v3586_v32 = vadd.f32 %v4161_v13, %v3545_v15  ;;  %v3548_v33 = vadd.f32 %v4142_v30, %v3507_v52  ;;  %v4031_v13 = vld [vmem:[%s5557_s15] ss:$0 sm:$0xff] }
 0xaa0   :  { %v3589_v34 = vadd.f32 %v4164_v31, %v3548_v33 }
 0xab8   :  { %v4181_v37 = vpop.f32.mrb[48].mxu1 }
 0xab9   :  { %v4203_v40 = vpop.f32.mrb[48].mxu0  ;;  %v4182_v41 = vpop.f32.mrb[49].mxu1 }
 0xaba   :  { %v4183_v36 = vadd.f32 %v4182_v41, %v4181_v37  ;;  %v4204_v42 = vpop.f32.mrb[49].mxu0  ;;  %v4184_v17 = vpop.f32.mrb[50].mxu1 }
 0xabb   :  { %v4205_v10 = vadd.f32 %v4204_v42, %v4203_v40  ;;  %v4206_v1 = vpop.f32.mrb[50].mxu0  ;;  %v4185_v43 = vpop.f32.mrb[51].mxu1 }
 0xabc   :  { %v3627_v44 = vadd.f32 %v4183_v36, %v3586_v32  ;;  %v4186_v45 = vadd.f32 %v4185_v43, %v4184_v17  ;;  %v4207_v11 = vpop.f32.mrb[51].mxu0 }
 0xabd   :  { %v4208_v46 = vadd.f32 %v4207_v11, %v4206_v1 }
 0xabe   :  { %v3668_v47 = vadd.f32 %v4205_v10, %v3627_v44  ;;  %v3630_v48 = vadd.f32 %v4186_v45, %v3589_v34 }
 0xac0   :  { %v3671_v49 = vadd.f32 %v4208_v46, %v3630_v48 }
 0xad8   :  { %v4225_v50 = vpop.f32.mrb[52].mxu1 }
 0xad9   :  { %v4247_v53 = vpop.f32.mrb[52].mxu0  ;;  %v4226_v54 = vpop.f32.mrb[53].mxu1 }
 0xada   :  { %v4227_v55 = vadd.f32 %v4226_v54, %v4225_v50  ;;  %v4248_v56 = vpop.f32.mrb[53].mxu0  ;;  %v4228_v57 = vpop.f32.mrb[54].mxu1 }
 0xadb   :  { %v4249_v58 = vadd.f32 %v4248_v56, %v4247_v53  ;;  %v4250_v59 = vpop.f32.mrb[54].mxu0  ;;  %v4229_v63 = vpop.f32.mrb[55].mxu1 }
 0xadc   :  { %v3709_v0 = vadd.f32 %v4227_v55, %v3668_v47  ;;  %v4230_v2 = vadd.f32 %v4229_v63, %v4228_v57  ;;  %v4251_v62 = vpop.f32.mrb[55].mxu0 }
 0xadd   :  { %v4252_v20 = vadd.f32 %v4251_v62, %v4250_v59 }
 0xade   :  { %v3750_v3 = vadd.f32 %v4249_v58, %v3709_v0  ;;  %v3712_v4 = vadd.f32 %v4230_v2, %v3671_v49 }
 0xae0   :  { %v3753_v5 = vadd.f32 %v4252_v20, %v3712_v4  ;;  %v3756_v23 = vadd.f32 %v3750_v3, %v4970_v60 }
 0xae2   :  { %v3760_v39 = vsel %vm84_vm1, %v3756_v23, 0.0  ;;  %v3757_v16 = vadd.f32 %v3753_v5, %v4972_v61 }
 0xae3   :  { %3761 = vadd.xlane.f32.xlu1 %v3760_v39 }
 0xae4   :  { %v3763_v6 = vsel %vm84_vm1, %v3757_v16, 0.0 }
 0xae5   :  { %3764 = vadd.xlane.f32.xlu0 %v3763_v6 }
 0xb70   :  { %v3762_v35 = vpop.xlane.xlu1 %3761 }
 0xb71   :  { %v3766_v7 = vmul.f32 0.03125, %v3762_v35 }
 0xb72   :  { %v3765_v9 = vpop.xlane.xlu0 %3764 }
 0xb73   :  { %v3768_v14 = vsub.f32 %v3756_v23, %v3766_v7  ;;  %v3767_v8 = vmul.f32 0.03125, %v3765_v9 }
 0xb75   :  { %v3769_v24 = vsub.f32 %v3757_v16, %v3767_v8  ;;  %v3770_v38 = vmul.f32 %v3768_v14, %v3768_v14 }
 0xb77   :  { %v3772_v51 = vsel %vm84_vm1, %v3770_v38, 0.0  ;;  %v3771_v18 = vmul.f32 %v3769_v24, %v3769_v24 }
 0xb78   :  { %3773 = vadd.xlane.f32.xlu1 %v3772_v51 }
 0xb79   :  { %v3775_v60 = vsel %vm84_vm1, %v3771_v18, 0.0 }
 0xb7a   :  { %3776 = vadd.xlane.f32.xlu0 %v3775_v60 }
 0xc05   :  { %v3774_v52 = vpop.xlane.xlu1 %3773 }
 0xc06   :  { %v3778_v61 = vmul.f32 0.03125, %v3774_v52 }
 0xc07   :  { %v3777_v19 = vpop.xlane.xlu0 %3776 }
 0xc08   :  { %v3780_v21 = vadd.f32 1e-05, %v3778_v61  ;;  %v3779_v22 = vmul.f32 0.03125, %v3777_v19 }
 0xc0a   :  { %4563 = vrsqrt.f32 %v3780_v21  ;;  %v3781_v12 = vadd.f32 1e-05, %v3779_v22 }
 0xc0c   :  { %4565 = vrsqrt.f32 %v3781_v12 }
 0xc14   :  { %v4564_v25 = vpop.eup %4563 }
 0xc15   :  { %v3784_v26 = vmul.f32 %v4564_v25, %v3768_v14 }
 0xc16   :  { %v4566_v27 = vpop.eup %4565 }
 0xc17   :  { %v3785_v29 = vmul.f32 %v4566_v27, %v3769_v24  ;;  %v3792_v15 = vmul.f32 %v4031_v13, %v3784_v26 }
 0xc19   :  { %v3793_v30 = vmul.f32 %v4031_v13, %v3785_v29  ;;  %v3800_v31 = vadd.f32 %v4032_v28, %v3792_v15 }
 0xc1b   :  { %v3801_v32 = vadd.f32 %v4032_v28, %v3793_v30  ;;  %3802 = vst.msk [vmem:[#allocation2] sm:$0xff] %vm84_vm1, %v3800_v31 }
 0xc1d   :  { %3803 = vst.msk [vmem:[#allocation2 + $0x8] sm:$0xff] %vm84_vm1, %v3801_v32 }
 0xc1e   :  { %4580 = shalt.err (!%p4577_p4)
}
 0xc1f   :  { %s4581_s24 = scalar_lea.hbm %s5559_s17, 256 }
 0xc20   :  { %p4582_p5 = scmp.ne.s32.totalorder %s5559_s17, %s4581_s24  ;;  %p4585_p6 = scmp.lt.u32.totalorder %s4581_s24, %s5559_s17 }
 0xc22   :  { %p4587_p7 = pnand %p4585_p6, %p4582_p5 }
 0xc24   :  { %4590 = shalt.err (!%p4587_p7)
}
 0xc25   :  { %s4603_s12 = smov 128  }
 0xc26   :  { %3815 = dma.vmem_to_hbm [thread:$0]  %s3810_s7, 256, %s5559_s17, [#allocation3], %s4603_s12, %s4603_s12, %s4598_s21  }
 0xc27   :  { %4591 = dma.done.wait [#allocation3], 256  }
 0xc28   :  { %4592 = vsyncadd [#allocation3], 4294967040 }
 0xc29   :  { %3819 = vsyncpa [#allocation3], 1 }

</bundles_post_ra>
